<compile_context>
chip_gen: v7x
topology: tpu7x:2x2x1
jax: 0.10.0
libtpu: 0.0.40
codegen_flags: <defaults>
</compile_context>

<pallas_src>
import functools

import jax
import jax.numpy as jnp
from jax.experimental import pallas as pl
from jax.experimental.pallas import tpu as pltpu

_LANES = 128   # vreg lane width; final output is padded to this many columns
_HPAD = 128    # lane-padded hidden width
_BN_EPS = 1e-5


# ---------------------------------------------------------------------------
# Fused kernel: one grid step == one full minibatch forward
# ---------------------------------------------------------------------------
def _sage_fused_kernel(sizes_ref,                       # (B, 4) i32 SMEM (prefetch)
                       adj0_ref, adj1_ref, adj2_ref,    # (ND*, NS*) f32, squeezed
                       x_ref,                           # (NS, F_IN) f32
                       ws0_ref, wn0_ref, ws1_ref, wn1_ref, ws2_ref, wn2_ref,
                       dw1_ref, dw2_ref, dw3_ref,       # bf16, lane-padded
                       vec_ref,                         # (8, HPAD) f32 packed vectors
                       out_ref,                         # (ND2, LANES) f32
                       *, eps):
    b = pl.program_id(0)
    gamma = vec_ref[3:4, :]
    beta = vec_ref[4:5, :]

    def row_mask(n_rows, n_valid):
        ids = jax.lax.broadcasted_iota(jnp.int32, (n_rows, 1), 0)
        return (ids < n_valid).astype(jnp.float32)

    def sage_layer(adj_ref, h_bf, ws_ref, wn_ref, bias, n_valid, bn_relu):
        # mean aggregation + self/neighbor projections on the MXU
        # (bf16 in, f32 accumulate).
        adj_bf = adj_ref[...].astype(jnp.bfloat16)
        n_dst_pad = adj_bf.shape[0]
        h_neigh = jnp.dot(adj_bf, h_bf, preferred_element_type=jnp.float32)
        out = (jnp.dot(h_bf[:n_dst_pad, :], ws_ref[...],
                       preferred_element_type=jnp.float32)
               + jnp.dot(h_neigh.astype(jnp.bfloat16), wn_ref[...],
                         preferred_element_type=jnp.float32)
               + bias)
        mask = row_mask(n_dst_pad, n_valid)
        out = out * mask                      # zero padded dst rows
        if bn_relu:
            # one-pass batch statistics over the true n_valid rows (padded rows
            # are zero and contribute nothing); biased variance, fused BN+ReLU.
            inv_n = 1.0 / n_valid.astype(jnp.float32)
            s = jnp.sum(out, axis=0, keepdims=True)
            ss = jnp.sum(out * out, axis=0, keepdims=True)
            mean = s * inv_n
            var = jnp.maximum(ss * inv_n - mean * mean, 0.0)
            out = (out - mean) * jax.lax.rsqrt(var + eps)
            out = jnp.maximum(out * gamma + beta, 0.0) * mask
            # TODO(synk): nn.Dropout(0.5) treated as identity (eval mode).
        return out

    n_d0 = sizes_ref[b, 1]
    n_d1 = sizes_ref[b, 2]
    n_d2 = sizes_ref[b, 3]

    h = x_ref[...].astype(jnp.bfloat16)                               # (NS, F_IN)
    h = sage_layer(adj0_ref, h, ws0_ref, wn0_ref, vec_ref[0:1, :], n_d0, True)
    h = sage_layer(adj1_ref, h.astype(jnp.bfloat16), ws1_ref, wn1_ref,
                   vec_ref[1:2, :], n_d1, True)
    h = sage_layer(adj2_ref, h.astype(jnp.bfloat16), ws2_ref, wn2_ref,
                   vec_ref[2:3, :], n_d2, False)

    # decoder: Linear+ReLU -> Linear+ReLU -> Linear(hid->1), lane-padded to
    # 128 output columns so the final store is lane-dense (unmasked vst).
    h = jnp.maximum(
        jnp.dot(h.astype(jnp.bfloat16), dw1_ref[...],
                preferred_element_type=jnp.float32) + vec_ref[5:6, :], 0.0)
    h = jnp.maximum(
        jnp.dot(h.astype(jnp.bfloat16), dw2_ref[...],
                preferred_element_type=jnp.float32) + vec_ref[6:7, :], 0.0)
    out = (jnp.dot(h.astype(jnp.bfloat16), dw3_ref[...],
                   preferred_element_type=jnp.float32)
           + vec_ref[7:8, 0:1])                                       # scalar b3
    out_ref[...] = out * row_mask(out.shape[0], n_d2)


# ---------------------------------------------------------------------------
# Wrapper
# ---------------------------------------------------------------------------
def sage_forward(adjs, x, sizes, params, *, eps=_BN_EPS):
    """Batched SAGE forward.

    adjs : [ (B, ND0, NS), (B, ND1, ND0), (B, ND2, ND1) ] f32, zero-padded.
    x    : (B, NS, F_IN) f32, zero-padded rows.
    sizes: (B, 4) int32 true sizes [n_src, n_dst0, n_dst1, n_dst2].
    Returns (B, ND2, 1) f32 (rows >= n_dst2 are zero).
    """
    B = x.shape[0]
    nd0, ns = adjs[0].shape[1], adjs[0].shape[2]
    nd1 = adjs[1].shape[1]
    nd2 = adjs[2].shape[1]
    f_in = x.shape[-1]
    hid = params["bn_gamma"].shape[-1]
    assert hid <= _HPAD and f_in <= _HPAD

    # lane-pad weights to HPAD columns (and rows where input is hidden-sized);
    # these are freshly-built small arrays, materialized directly in bf16.
    def pad_w(w, rows, cols):
        buf = jnp.zeros((rows, cols), jnp.bfloat16)
        return buf.at[:w.shape[0], :w.shape[1]].set(w.astype(jnp.bfloat16))

    L = params["layers"]
    d = params["decoder"]
    weights = [
        pad_w(L[0]["w_self"], f_in, _HPAD), pad_w(L[0]["w_neigh"], f_in, _HPAD),
        pad_w(L[1]["w_self"], _HPAD, _HPAD), pad_w(L[1]["w_neigh"], _HPAD, _HPAD),
        pad_w(L[2]["w_self"], _HPAD, _HPAD), pad_w(L[2]["w_neigh"], _HPAD, _HPAD),
        pad_w(d["w1"], _HPAD, _HPAD), pad_w(d["w2"], _HPAD, _HPAD),
        pad_w(d["w3"], _HPAD, _LANES),
    ]

    def pad_vec(v):
        buf = jnp.zeros((1, _HPAD), jnp.float32)
        return buf.at[:, :v.shape[-1]].set(v.astype(jnp.float32))

    # packed parameter vectors: rows = [bias0, bias1, bias2, gamma, beta,
    #                                   dec_b1, dec_b2, dec_b3(lane 0)]
    vec = jnp.concatenate([
        pad_vec(L[0]["bias"]), pad_vec(L[1]["bias"]), pad_vec(L[2]["bias"]),
        pad_vec(params["bn_gamma"]), pad_vec(params["bn_beta"]),
        pad_vec(d["b1"]), pad_vec(d["b2"]), pad_vec(d["b3"]),
    ], axis=0)

    batch_spec = lambda shape: pl.BlockSpec((None,) + shape,
                                            lambda b, sz: (b, 0, 0))
    const_spec = lambda shape: pl.BlockSpec(shape, lambda b, sz: (0, 0))

    grid_spec = pltpu.PrefetchScalarGridSpec(
        num_scalar_prefetch=1,
        grid=(B,),
        in_specs=[
            batch_spec((nd0, ns)),
            batch_spec((nd1, nd0)),
            batch_spec((nd2, nd1)),
            batch_spec((ns, f_in)),
            *[const_spec(tuple(w.shape)) for w in weights],
            const_spec((8, _HPAD)),
        ],
        out_specs=batch_spec((nd2, _LANES)),
    )

    kernel = functools.partial(_sage_fused_kernel, eps=eps)
    out = pl.pallas_call(
        kernel,
        out_shape=jax.ShapeDtypeStruct((B, nd2, _LANES), jnp.float32),
        grid_spec=grid_spec,
        compiler_params=pltpu.CompilerParams(
            dimension_semantics=("parallel",)),
    )(sizes, adjs[0], adjs[1], adjs[2], x, *weights, vec)
    return out[..., :1]


# ---------------------------------------------------------------------------
# Pure-JAX reference (f32, true shapes) for validation
# ---------------------------------------------------------------------------
def _reference_forward(adjs, x, params, eps=_BN_EPS):
    h = x
    n_layers = len(adjs)
    for l, adj in enumerate(adjs):
        p = params["layers"][l]
        n_dst = adj.shape[0]
        h_neigh = adj @ h
        h = h[:n_dst] @ p["w_self"] + h_neigh @ p["w_neigh"] + p["bias"]
        if l != n_layers - 1:
            mean = h.mean(axis=0, keepdims=True)
            var = ((h - mean) ** 2).mean(axis=0, keepdims=True)
            h = (h - mean) * jax.lax.rsqrt(var + eps)
            h = jnp.maximum(h * params["bn_gamma"] + params["bn_beta"], 0.0)
    d = params["decoder"]
    h = jnp.maximum(h @ d["w1"] + d["b1"], 0.0)
    h = jnp.maximum(h @ d["w2"] + d["b2"], 0.0)
    return h @ d["w3"] + d["b3"]


# ---------------------------------------------------------------------------
# Deterministic setup + run
# ---------------------------------------------------------------------------
def _make_block_adj(key, n_dst, n_src):
    """Random 0/1 adjacency (n_dst, n_src), row-normalized for 'mean' agg."""
    a = (jax.random.uniform(key, (n_dst, n_src)) < 0.25).astype(jnp.float32)
    # ensure a self edge so no dst node is isolated (dst = first n_dst srcs)
    a = a.at[jnp.arange(n_dst), jnp.arange(n_dst)].set(1.0)
    deg = jnp.maximum(a.sum(axis=1, keepdims=True), 1.0)
    return a / deg


if __name__ == "__main__":
    in_size, hid_size = 16, 32
    B = 4
    # padded MFG bucket sizes (multiples of 16 sublanes)
    NS, ND0, ND1, ND2 = 64, 48, 32, 16
    # true per-minibatch sizes: [n_src, n_dst0, n_dst1, n_dst2]
    true_sizes = [(64, 48, 32, 16),
                  (56, 40, 24, 12),
                  (48, 36, 28, 16),
                  (64, 44, 30, 10)]

    key = jax.random.PRNGKey(0)
    keys = iter(jax.random.split(key, 48))

    # build B minibatches: true-shaped blocks + zero-padded batched arrays
    A0 = jnp.zeros((B, ND0, NS), jnp.float32)
    A1 = jnp.zeros((B, ND1, ND0), jnp.float32)
    A2 = jnp.zeros((B, ND2, ND1), jnp.float32)
    X = jnp.zeros((B, NS, in_size), jnp.float32)
    adjs_true, xs_true = [], []
    for b, (ns, n0, n1, n2) in enumerate(true_sizes):
        a0 = _make_block_adj(next(keys), n0, ns)
        a1 = _make_block_adj(next(keys), n1, n0)
        a2 = _make_block_adj(next(keys), n2, n1)
        xb = jax.random.normal(next(keys), (ns, in_size), dtype=jnp.float32)
        adjs_true.append([a0, a1, a2])
        xs_true.append(xb)
        A0 = A0.at[b, :n0, :ns].set(a0)
        A1 = A1.at[b, :n1, :n0].set(a1)
        A2 = A2.at[b, :n2, :n1].set(a2)
        X = X.at[b, :ns, :].set(xb)
    sizes = jnp.array(true_sizes, dtype=jnp.int32)

    def lin(kk, fin, fout):
        return jax.random.normal(kk, (fin, fout), dtype=jnp.float32) * 0.1

    layer_dims = [(in_size, hid_size), (hid_size, hid_size), (hid_size, hid_size)]
    layers = []
    for fin, fout in layer_dims:
        layers.append({
            "w_self": lin(next(keys), fin, fout),
            "w_neigh": lin(next(keys), fin, fout),
            "bias": jax.random.normal(next(keys), (1, fout), jnp.float32) * 0.01,
        })

    params = {
        "layers": layers,
        "bn_gamma": jnp.ones((1, hid_size), dtype=jnp.float32),
        "bn_beta": jnp.zeros((1, hid_size), dtype=jnp.float32),
        "decoder": {
            "w1": lin(next(keys), hid_size, hid_size),
            "b1": jax.random.normal(next(keys), (1, hid_size), jnp.float32) * 0.01,
            "w2": lin(next(keys), hid_size, hid_size),
            "b2": jax.random.normal(next(keys), (1, hid_size), jnp.float32) * 0.01,
            "w3": lin(next(keys), hid_size, 1),
            "b3": jax.random.normal(next(keys), (1, 1), jnp.float32) * 0.01,
        },
    }

    out = sage_forward([A0, A1, A2], X, sizes, params)
    out = jax.block_until_ready(out)
    assert out.shape == (B, ND2, 1), out.shape
    assert bool(jnp.all(jnp.isfinite(out)))

    max_diff = 0.0
    for b in range(B):
        n2 = true_sizes[b][3]
        ref = _reference_forward(adjs_true[b], xs_true[b], params)
        diff = float(jnp.max(jnp.abs(out[b, :n2, :] - ref)))
        max_diff = max(max_diff, diff)
    assert max_diff < 0.1, max_diff  # loose tolerance: bf16 MXU vs f32 reference

    print("KERNEL_OK")
</pallas_src>

<mosaic_0001>
module attributes {stable_mosaic.version = 11 : i64} {
  func.func @_sage_fused_kernel(%arg0: i32, %arg1: memref<4x4xi32, #tpu.memory_space<smem>>, %arg2: memref<1x48x64xf32, #tpu.memory_space<vmem>>, %arg3: memref<1x32x48xf32, #tpu.memory_space<vmem>>, %arg4: memref<1x16x32xf32, #tpu.memory_space<vmem>>, %arg5: memref<1x64x16xf32, #tpu.memory_space<vmem>>, %arg6: memref<16x128xbf16, #tpu.memory_space<vmem>>, %arg7: memref<16x128xbf16, #tpu.memory_space<vmem>>, %arg8: memref<128x128xbf16, #tpu.memory_space<vmem>>, %arg9: memref<128x128xbf16, #tpu.memory_space<vmem>>, %arg10: memref<128x128xbf16, #tpu.memory_space<vmem>>, %arg11: memref<128x128xbf16, #tpu.memory_space<vmem>>, %arg12: memref<128x128xbf16, #tpu.memory_space<vmem>>, %arg13: memref<128x128xbf16, #tpu.memory_space<vmem>>, %arg14: memref<128x128xbf16, #tpu.memory_space<vmem>>, %arg15: memref<8x128xf32, #tpu.memory_space<vmem>>, %arg16: memref<1x16x128xf32, #tpu.memory_space<vmem>>) attributes {dimension_semantics = [#tpu.dimension_semantics<parallel>], iteration_bounds = array<i64: 4>, scalar_prefetch = 1 : i64, scratch_operands = 0 : i64, tpu.core_type = #tpu.core_type<tc>, window_params = [{transform_indices = @transform_0, window_bounds = array<i64: 1, 48, 64>}, {transform_indices = @transform_1, window_bounds = array<i64: 1, 32, 48>}, {transform_indices = @transform_2, window_bounds = array<i64: 1, 16, 32>}, {transform_indices = @transform_3, window_bounds = array<i64: 1, 64, 16>}, {pipeline_mode = #tpu.pipeline_mode<synchronous>, transform_indices = @transform_4, window_bounds = array<i64: 16, 128>}, {pipeline_mode = #tpu.pipeline_mode<synchronous>, transform_indices = @transform_5, window_bounds = array<i64: 16, 128>}, {pipeline_mode = #tpu.pipeline_mode<synchronous>, transform_indices = @transform_6, window_bounds = array<i64: 128, 128>}, {pipeline_mode = #tpu.pipeline_mode<synchronous>, transform_indices = @transform_7, window_bounds = array<i64: 128, 128>}, {pipeline_mode = #tpu.pipeline_mode<synchronous>, transform_indices = @transform_8, window_bounds = array<i64: 128, 128>}, {pipeline_mode = #tpu.pipeline_mode<synchronous>, transform_indices = @transform_9, window_bounds = array<i64: 128, 128>}, {pipeline_mode = #tpu.pipeline_mode<synchronous>, transform_indices = @transform_10, window_bounds = array<i64: 128, 128>}, {pipeline_mode = #tpu.pipeline_mode<synchronous>, transform_indices = @transform_11, window_bounds = array<i64: 128, 128>}, {pipeline_mode = #tpu.pipeline_mode<synchronous>, transform_indices = @transform_12, window_bounds = array<i64: 128, 128>}, {pipeline_mode = #tpu.pipeline_mode<synchronous>, transform_indices = @transform_13, window_bounds = array<i64: 8, 128>}, {transform_indices = @transform_14, window_bounds = array<i64: 1, 16, 128>}]} {
    %c3 = arith.constant 3 : index
    %c0 = arith.constant 0 : index
    %0 = vector.load %arg15[%c3, %c0] : memref<8x128xf32, #tpu.memory_space<vmem>>, vector<1x128xf32>
    %c4 = arith.constant 4 : index
    %c0_0 = arith.constant 0 : index
    %1 = vector.load %arg15[%c4, %c0_0] : memref<8x128xf32, #tpu.memory_space<vmem>>, vector<1x128xf32>
    %2 = arith.index_cast %arg0 : i32 to index
    %c1 = arith.constant 1 : index
    %3 = memref.load %arg1[%2, %c1] : memref<4x4xi32, #tpu.memory_space<smem>>
    %4 = arith.index_cast %arg0 : i32 to index
    %c2 = arith.constant 2 : index
    %5 = memref.load %arg1[%4, %c2] : memref<4x4xi32, #tpu.memory_space<smem>>
    %6 = arith.index_cast %arg0 : i32 to index
    %c3_1 = arith.constant 3 : index
    %7 = memref.load %arg1[%6, %c3_1] : memref<4x4xi32, #tpu.memory_space<smem>>
    %c0_2 = arith.constant 0 : index
    %c0_3 = arith.constant 0 : index
    %c0_4 = arith.constant 0 : index
    %8 = vector.load %arg5[%c0_2, %c0_3, %c0_4] : memref<1x64x16xf32, #tpu.memory_space<vmem>>, vector<1x64x16xf32>
    %9 = vector.shape_cast %8 : vector<1x64x16xf32> to vector<64x16xf32>
    %10 = arith.truncf %9 : vector<64x16xf32> to vector<64x16xbf16>
    %c0_5 = arith.constant 0 : index
    %c0_6 = arith.constant 0 : index
    %11 = vector.load %arg15[%c0_5, %c0_6] : memref<8x128xf32, #tpu.memory_space<vmem>>, vector<1x128xf32>
    %c0_7 = arith.constant 0 : index
    %c0_8 = arith.constant 0 : index
    %c0_9 = arith.constant 0 : index
    %12 = vector.load %arg2[%c0_7, %c0_8, %c0_9] : memref<1x48x64xf32, #tpu.memory_space<vmem>>, vector<1x48x64xf32>
    %13 = vector.shape_cast %12 : vector<1x48x64xf32> to vector<48x64xf32>
    %14 = arith.truncf %13 : vector<48x64xf32> to vector<48x64xbf16>
    %cst = arith.constant dense<0.000000e+00> : vector<48x16xf32>
    %15 = tpu.matmul %14, %10, %cst {dimension_numbers = #tpu.dot_dimension_numbers<[1], [0], [0], [1], [0, 0, 1, 1], [], []>} : vector<48x64xbf16>, vector<64x16xbf16>, vector<48x16xf32> -> vector<48x16xf32>
    %16 = vector.extract_strided_slice %10 {offsets = [0, 0], sizes = [48, 16], strides = [1, 1]} : vector<64x16xbf16> to vector<48x16xbf16>
    %c0_10 = arith.constant 0 : index
    %c0_11 = arith.constant 0 : index
    %17 = vector.load %arg6[%c0_10, %c0_11] : memref<16x128xbf16, #tpu.memory_space<vmem>>, vector<16x128xbf16>
    %cst_12 = arith.constant dense<0.000000e+00> : vector<48x128xf32>
    %18 = tpu.matmul %16, %17, %cst_12 {dimension_numbers = #tpu.dot_dimension_numbers<[1], [0], [0], [1], [0, 0, 1, 1], [], []>} : vector<48x16xbf16>, vector<16x128xbf16>, vector<48x128xf32> -> vector<48x128xf32>
    %19 = arith.truncf %15 : vector<48x16xf32> to vector<48x16xbf16>
    %c0_13 = arith.constant 0 : index
    %c0_14 = arith.constant 0 : index
    %20 = vector.load %arg7[%c0_13, %c0_14] : memref<16x128xbf16, #tpu.memory_space<vmem>>, vector<16x128xbf16>
    %cst_15 = arith.constant dense<0.000000e+00> : vector<48x128xf32>
    %21 = tpu.matmul %19, %20, %cst_15 {dimension_numbers = #tpu.dot_dimension_numbers<[1], [0], [0], [1], [0, 0, 1, 1], [], []>} : vector<48x16xbf16>, vector<16x128xbf16>, vector<48x128xf32> -> vector<48x128xf32>
    %22 = arith.addf %18, %21 : vector<48x128xf32>
    %23 = vector.broadcast %11 : vector<1x128xf32> to vector<48x128xf32>
    %24 = arith.addf %22, %23 : vector<48x128xf32>
    %25 = tpu.iota {dimensions = array<i32: 0>} : vector<48x1xi32>
    %26 = vector.broadcast %3 : i32 to vector<48x1xi32>
    %27 = arith.cmpi slt, %25, %26 : vector<48x1xi32>
    %28 = arith.extui %27 : vector<48x1xi1> to vector<48x1xi32>
    %29 = arith.sitofp %28 : vector<48x1xi32> to vector<48x1xf32>
    %30 = vector.broadcast %29 : vector<48x1xf32> to vector<48x128xf32>
    %31 = arith.mulf %24, %30 : vector<48x128xf32>
    %32 = arith.sitofp %3 : i32 to f32
    %cst_16 = arith.constant 1.000000e+00 : f32
    %33 = arith.divf %cst_16, %32 : f32
    %cst_17 = arith.constant dense<0.000000e+00> : vector<128xf32>
    %34 = vector.multi_reduction <add>, %31, %cst_17 [0] : vector<48x128xf32> to vector<128xf32>
    %35 = vector.shape_cast %34 : vector<128xf32> to vector<1x128xf32>
    %36 = arith.mulf %31, %31 : vector<48x128xf32>
    %cst_18 = arith.constant dense<0.000000e+00> : vector<128xf32>
    %37 = vector.multi_reduction <add>, %36, %cst_18 [0] : vector<48x128xf32> to vector<128xf32>
    %38 = vector.shape_cast %37 : vector<128xf32> to vector<1x128xf32>
    %39 = vector.broadcast %33 : f32 to vector<1x128xf32>
    %40 = arith.mulf %35, %39 : vector<1x128xf32>
    %41 = vector.broadcast %33 : f32 to vector<1x128xf32>
    %42 = arith.mulf %38, %41 : vector<1x128xf32>
    %43 = arith.mulf %40, %40 : vector<1x128xf32>
    %44 = arith.subf %42, %43 : vector<1x128xf32>
    %cst_19 = arith.constant 0.000000e+00 : f32
    %45 = vector.broadcast %cst_19 : f32 to vector<1x128xf32>
    %46 = arith.maximumf %44, %45 : vector<1x128xf32>
    %47 = vector.broadcast %40 : vector<1x128xf32> to vector<48x128xf32>
    %48 = arith.subf %31, %47 : vector<48x128xf32>
    %cst_20 = arith.constant 9.99999974E-6 : f32
    %49 = vector.broadcast %cst_20 : f32 to vector<1x128xf32>
    %50 = arith.addf %46, %49 : vector<1x128xf32>
    %51 = math.rsqrt %50 : vector<1x128xf32>
    %52 = vector.broadcast %51 : vector<1x128xf32> to vector<48x128xf32>
    %53 = arith.mulf %48, %52 : vector<48x128xf32>
    %54 = vector.broadcast %0 : vector<1x128xf32> to vector<48x128xf32>
    %55 = arith.mulf %53, %54 : vector<48x128xf32>
    %56 = vector.broadcast %1 : vector<1x128xf32> to vector<48x128xf32>
    %57 = arith.addf %55, %56 : vector<48x128xf32>
    %cst_21 = arith.constant 0.000000e+00 : f32
    %58 = vector.broadcast %cst_21 : f32 to vector<48x128xf32>
    %59 = arith.maximumf %57, %58 : vector<48x128xf32>
    %60 = vector.broadcast %29 : vector<48x1xf32> to vector<48x128xf32>
    %61 = arith.mulf %59, %60 : vector<48x128xf32>
    %62 = arith.truncf %61 : vector<48x128xf32> to vector<48x128xbf16>
    %c1_22 = arith.constant 1 : index
    %c0_23 = arith.constant 0 : index
    %63 = vector.load %arg15[%c1_22, %c0_23] : memref<8x128xf32, #tpu.memory_space<vmem>>, vector<1x128xf32>
    %c0_24 = arith.constant 0 : index
    %c0_25 = arith.constant 0 : index
    %c0_26 = arith.constant 0 : index
    %64 = vector.load %arg3[%c0_24, %c0_25, %c0_26] : memref<1x32x48xf32, #tpu.memory_space<vmem>>, vector<1x32x48xf32>
    %65 = vector.shape_cast %64 : vector<1x32x48xf32> to vector<32x48xf32>
    %66 = arith.truncf %65 : vector<32x48xf32> to vector<32x48xbf16>
    %cst_27 = arith.constant dense<0.000000e+00> : vector<32x128xf32>
    %67 = tpu.matmul %66, %62, %cst_27 {dimension_numbers = #tpu.dot_dimension_numbers<[1], [0], [0], [1], [0, 0, 1, 1], [], []>} : vector<32x48xbf16>, vector<48x128xbf16>, vector<32x128xf32> -> vector<32x128xf32>
    %68 = vector.extract_strided_slice %62 {offsets = [0, 0], sizes = [32, 128], strides = [1, 1]} : vector<48x128xbf16> to vector<32x128xbf16>
    %c0_28 = arith.constant 0 : index
    %c0_29 = arith.constant 0 : index
    %69 = vector.load %arg8[%c0_28, %c0_29] : memref<128x128xbf16, #tpu.memory_space<vmem>>, vector<128x128xbf16>
    %cst_30 = arith.constant dense<0.000000e+00> : vector<32x128xf32>
    %70 = tpu.matmul %68, %69, %cst_30 {dimension_numbers = #tpu.dot_dimension_numbers<[1], [0], [0], [1], [0, 0, 1, 1], [], []>} : vector<32x128xbf16>, vector<128x128xbf16>, vector<32x128xf32> -> vector<32x128xf32>
    %71 = arith.truncf %67 : vector<32x128xf32> to vector<32x128xbf16>
    %c0_31 = arith.constant 0 : index
    %c0_32 = arith.constant 0 : index
    %72 = vector.load %arg9[%c0_31, %c0_32] : memref<128x128xbf16, #tpu.memory_space<vmem>>, vector<128x128xbf16>
    %cst_33 = arith.constant dense<0.000000e+00> : vector<32x128xf32>
    %73 = tpu.matmul %71, %72, %cst_33 {dimension_numbers = #tpu.dot_dimension_numbers<[1], [0], [0], [1], [0, 0, 1, 1], [], []>} : vector<32x128xbf16>, vector<128x128xbf16>, vector<32x128xf32> -> vector<32x128xf32>
    %74 = arith.addf %70, %73 : vector<32x128xf32>
    %75 = vector.broadcast %63 : vector<1x128xf32> to vector<32x128xf32>
    %76 = arith.addf %74, %75 : vector<32x128xf32>
    %77 = tpu.iota {dimensions = array<i32: 0>} : vector<32x1xi32>
    %78 = vector.broadcast %5 : i32 to vector<32x1xi32>
    %79 = arith.cmpi slt, %77, %78 : vector<32x1xi32>
    %80 = arith.extui %79 : vector<32x1xi1> to vector<32x1xi32>
    %81 = arith.sitofp %80 : vector<32x1xi32> to vector<32x1xf32>
    %82 = vector.broadcast %81 : vector<32x1xf32> to vector<32x128xf32>
    %83 = arith.mulf %76, %82 : vector<32x128xf32>
    %84 = arith.sitofp %5 : i32 to f32
    %cst_34 = arith.constant 1.000000e+00 : f32
    %85 = arith.divf %cst_34, %84 : f32
    %cst_35 = arith.constant dense<0.000000e+00> : vector<128xf32>
    %86 = vector.multi_reduction <add>, %83, %cst_35 [0] : vector<32x128xf32> to vector<128xf32>
    %87 = vector.shape_cast %86 : vector<128xf32> to vector<1x128xf32>
    %88 = arith.mulf %83, %83 : vector<32x128xf32>
    %cst_36 = arith.constant dense<0.000000e+00> : vector<128xf32>
    %89 = vector.multi_reduction <add>, %88, %cst_36 [0] : vector<32x128xf32> to vector<128xf32>
    %90 = vector.shape_cast %89 : vector<128xf32> to vector<1x128xf32>
    %91 = vector.broadcast %85 : f32 to vector<1x128xf32>
    %92 = arith.mulf %87, %91 : vector<1x128xf32>
    %93 = vector.broadcast %85 : f32 to vector<1x128xf32>
    %94 = arith.mulf %90, %93 : vector<1x128xf32>
    %95 = arith.mulf %92, %92 : vector<1x128xf32>
    %96 = arith.subf %94, %95 : vector<1x128xf32>
    %cst_37 = arith.constant 0.000000e+00 : f32
    %97 = vector.broadcast %cst_37 : f32 to vector<1x128xf32>
    %98 = arith.maximumf %96, %97 : vector<1x128xf32>
    %99 = vector.broadcast %92 : vector<1x128xf32> to vector<32x128xf32>
    %100 = arith.subf %83, %99 : vector<32x128xf32>
    %cst_38 = arith.constant 9.99999974E-6 : f32
    %101 = vector.broadcast %cst_38 : f32 to vector<1x128xf32>
    %102 = arith.addf %98, %101 : vector<1x128xf32>
    %103 = math.rsqrt %102 : vector<1x128xf32>
    %104 = vector.broadcast %103 : vector<1x128xf32> to vector<32x128xf32>
    %105 = arith.mulf %100, %104 : vector<32x128xf32>
    %106 = vector.broadcast %0 : vector<1x128xf32> to vector<32x128xf32>
    %107 = arith.mulf %105, %106 : vector<32x128xf32>
    %108 = vector.broadcast %1 : vector<1x128xf32> to vector<32x128xf32>
    %109 = arith.addf %107, %108 : vector<32x128xf32>
    %cst_39 = arith.constant 0.000000e+00 : f32
    %110 = vector.broadcast %cst_39 : f32 to vector<32x128xf32>
    %111 = arith.maximumf %109, %110 : vector<32x128xf32>
    %112 = vector.broadcast %81 : vector<32x1xf32> to vector<32x128xf32>
    %113 = arith.mulf %111, %112 : vector<32x128xf32>
    %114 = arith.truncf %113 : vector<32x128xf32> to vector<32x128xbf16>
    %c2_40 = arith.constant 2 : index
    %c0_41 = arith.constant 0 : index
    %115 = vector.load %arg15[%c2_40, %c0_41] : memref<8x128xf32, #tpu.memory_space<vmem>>, vector<1x128xf32>
    %c0_42 = arith.constant 0 : index
    %c0_43 = arith.constant 0 : index
    %c0_44 = arith.constant 0 : index
    %116 = vector.load %arg4[%c0_42, %c0_43, %c0_44] : memref<1x16x32xf32, #tpu.memory_space<vmem>>, vector<1x16x32xf32>
    %117 = vector.shape_cast %116 : vector<1x16x32xf32> to vector<16x32xf32>
    %118 = arith.truncf %117 : vector<16x32xf32> to vector<16x32xbf16>
    %cst_45 = arith.constant dense<0.000000e+00> : vector<16x128xf32>
    %119 = tpu.matmul %118, %114, %cst_45 {dimension_numbers = #tpu.dot_dimension_numbers<[1], [0], [0], [1], [0, 0, 1, 1], [], []>} : vector<16x32xbf16>, vector<32x128xbf16>, vector<16x128xf32> -> vector<16x128xf32>
    %120 = vector.extract_strided_slice %114 {offsets = [0, 0], sizes = [16, 128], strides = [1, 1]} : vector<32x128xbf16> to vector<16x128xbf16>
    %c0_46 = arith.constant 0 : index
    %c0_47 = arith.constant 0 : index
    %121 = vector.load %arg10[%c0_46, %c0_47] : memref<128x128xbf16, #tpu.memory_space<vmem>>, vector<128x128xbf16>
    %cst_48 = arith.constant dense<0.000000e+00> : vector<16x128xf32>
    %122 = tpu.matmul %120, %121, %cst_48 {dimension_numbers = #tpu.dot_dimension_numbers<[1], [0], [0], [1], [0, 0, 1, 1], [], []>} : vector<16x128xbf16>, vector<128x128xbf16>, vector<16x128xf32> -> vector<16x128xf32>
    %123 = arith.truncf %119 : vector<16x128xf32> to vector<16x128xbf16>
    %c0_49 = arith.constant 0 : index
    %c0_50 = arith.constant 0 : index
    %124 = vector.load %arg11[%c0_49, %c0_50] : memref<128x128xbf16, #tpu.memory_space<vmem>>, vector<128x128xbf16>
    %cst_51 = arith.constant dense<0.000000e+00> : vector<16x128xf32>
    %125 = tpu.matmul %123, %124, %cst_51 {dimension_numbers = #tpu.dot_dimension_numbers<[1], [0], [0], [1], [0, 0, 1, 1], [], []>} : vector<16x128xbf16>, vector<128x128xbf16>, vector<16x128xf32> -> vector<16x128xf32>
    %126 = arith.addf %122, %125 : vector<16x128xf32>
    %127 = vector.broadcast %115 : vector<1x128xf32> to vector<16x128xf32>
    %128 = arith.addf %126, %127 : vector<16x128xf32>
    %129 = tpu.iota {dimensions = array<i32: 0>} : vector<16x1xi32>
    %130 = vector.broadcast %7 : i32 to vector<16x1xi32>
    %131 = arith.cmpi slt, %129, %130 : vector<16x1xi32>
    %132 = arith.extui %131 : vector<16x1xi1> to vector<16x1xi32>
    %133 = arith.sitofp %132 : vector<16x1xi32> to vector<16x1xf32>
    %134 = vector.broadcast %133 : vector<16x1xf32> to vector<16x128xf32>
    %135 = arith.mulf %128, %134 : vector<16x128xf32>
    %136 = arith.truncf %135 : vector<16x128xf32> to vector<16x128xbf16>
    %c0_52 = arith.constant 0 : index
    %c0_53 = arith.constant 0 : index
    %137 = vector.load %arg12[%c0_52, %c0_53] : memref<128x128xbf16, #tpu.memory_space<vmem>>, vector<128x128xbf16>
    %cst_54 = arith.constant dense<0.000000e+00> : vector<16x128xf32>
    %138 = tpu.matmul %136, %137, %cst_54 {dimension_numbers = #tpu.dot_dimension_numbers<[1], [0], [0], [1], [0, 0, 1, 1], [], []>} : vector<16x128xbf16>, vector<128x128xbf16>, vector<16x128xf32> -> vector<16x128xf32>
    %c5 = arith.constant 5 : index
    %c0_55 = arith.constant 0 : index
    %139 = vector.load %arg15[%c5, %c0_55] : memref<8x128xf32, #tpu.memory_space<vmem>>, vector<1x128xf32>
    %140 = vector.broadcast %139 : vector<1x128xf32> to vector<16x128xf32>
    %141 = arith.addf %138, %140 : vector<16x128xf32>
    %cst_56 = arith.constant 0.000000e+00 : f32
    %142 = vector.broadcast %cst_56 : f32 to vector<16x128xf32>
    %143 = arith.maximumf %141, %142 : vector<16x128xf32>
    %144 = arith.truncf %143 : vector<16x128xf32> to vector<16x128xbf16>
    %c0_57 = arith.constant 0 : index
    %c0_58 = arith.constant 0 : index
    %145 = vector.load %arg13[%c0_57, %c0_58] : memref<128x128xbf16, #tpu.memory_space<vmem>>, vector<128x128xbf16>
    %cst_59 = arith.constant dense<0.000000e+00> : vector<16x128xf32>
    %146 = tpu.matmul %144, %145, %cst_59 {dimension_numbers = #tpu.dot_dimension_numbers<[1], [0], [0], [1], [0, 0, 1, 1], [], []>} : vector<16x128xbf16>, vector<128x128xbf16>, vector<16x128xf32> -> vector<16x128xf32>
    %c6 = arith.constant 6 : index
    %c0_60 = arith.constant 0 : index
    %147 = vector.load %arg15[%c6, %c0_60] : memref<8x128xf32, #tpu.memory_space<vmem>>, vector<1x128xf32>
    %148 = vector.broadcast %147 : vector<1x128xf32> to vector<16x128xf32>
    %149 = arith.addf %146, %148 : vector<16x128xf32>
    %cst_61 = arith.constant 0.000000e+00 : f32
    %150 = vector.broadcast %cst_61 : f32 to vector<16x128xf32>
    %151 = arith.maximumf %149, %150 : vector<16x128xf32>
    %152 = arith.truncf %151 : vector<16x128xf32> to vector<16x128xbf16>
    %c0_62 = arith.constant 0 : index
    %c0_63 = arith.constant 0 : index
    %153 = vector.load %arg14[%c0_62, %c0_63] : memref<128x128xbf16, #tpu.memory_space<vmem>>, vector<128x128xbf16>
    %cst_64 = arith.constant dense<0.000000e+00> : vector<16x128xf32>
    %154 = tpu.matmul %152, %153, %cst_64 {dimension_numbers = #tpu.dot_dimension_numbers<[1], [0], [0], [1], [0, 0, 1, 1], [], []>} : vector<16x128xbf16>, vector<128x128xbf16>, vector<16x128xf32> -> vector<16x128xf32>
    %c7 = arith.constant 7 : index
    %c0_65 = arith.constant 0 : index
    %155 = vector.load %arg15[%c7, %c0_65] : memref<8x128xf32, #tpu.memory_space<vmem>>, vector<1x1xf32>
    %156 = vector.broadcast %155 : vector<1x1xf32> to vector<16x128xf32>
    %157 = arith.addf %154, %156 : vector<16x128xf32>
    %158 = tpu.iota {dimensions = array<i32: 0>} : vector<16x1xi32>
    %159 = vector.broadcast %7 : i32 to vector<16x1xi32>
    %160 = arith.cmpi slt, %158, %159 : vector<16x1xi32>
    %161 = arith.extui %160 : vector<16x1xi1> to vector<16x1xi32>
    %162 = arith.sitofp %161 : vector<16x1xi32> to vector<16x1xf32>
    %163 = vector.broadcast %162 : vector<16x1xf32> to vector<16x128xf32>
    %164 = arith.mulf %157, %163 : vector<16x128xf32>
    %c0_66 = arith.constant 0 : index
    %c0_67 = arith.constant 0 : index
    %c0_68 = arith.constant 0 : index
    %165 = vector.load %arg16[%c0_66, %c0_67, %c0_68] : memref<1x16x128xf32, #tpu.memory_space<vmem>>, vector<1x16x128xf32>
    %166 = vector.shape_cast %165 : vector<1x16x128xf32> to vector<16x128xf32>
    %167 = vector.shape_cast %164 : vector<16x128xf32> to vector<1x16x128xf32>
    tpu.vector_store %arg16[%c0_66, %c0_67, %c0_68], %167 {strides = array<i32>} : memref<1x16x128xf32, #tpu.memory_space<vmem>>, vector<1x16x128xf32>,
    return
  }
  func.func @transform_0(%arg0: i32, %arg1: memref<4x4xi32, #tpu.memory_space<smem>>) -> (i32, i32, i32) {
    %c0_i32 = arith.constant 0 : i32
    %c0_i32_0 = arith.constant 0 : i32
    %c0_i32_1 = arith.constant 0 : i32
    return %arg0, %c0_i32, %c0_i32_0 : i32, i32, i32
  }
  func.func @transform_1(%arg0: i32, %arg1: memref<4x4xi32, #tpu.memory_space<smem>>) -> (i32, i32, i32) {
    %c0_i32 = arith.constant 0 : i32
    %c0_i32_0 = arith.constant 0 : i32
    %c0_i32_1 = arith.constant 0 : i32
    return %arg0, %c0_i32, %c0_i32_0 : i32, i32, i32
  }
  func.func @transform_2(%arg0: i32, %arg1: memref<4x4xi32, #tpu.memory_space<smem>>) -> (i32, i32, i32) {
    %c0_i32 = arith.constant 0 : i32
    %c0_i32_0 = arith.constant 0 : i32
    %c0_i32_1 = arith.constant 0 : i32
    return %arg0, %c0_i32, %c0_i32_0 : i32, i32, i32
  }
  func.func @transform_3(%arg0: i32, %arg1: memref<4x4xi32, #tpu.memory_space<smem>>) -> (i32, i32, i32) {
    %c0_i32 = arith.constant 0 : i32
    %c0_i32_0 = arith.constant 0 : i32
    %c0_i32_1 = arith.constant 0 : i32
    return %arg0, %c0_i32, %c0_i32_0 : i32, i32, i32
  }
  func.func @transform_4(%arg0: i32, %arg1: memref<4x4xi32, #tpu.memory_space<smem>>) -> (i32, i32) {
    %c0_i32 = arith.constant 0 : i32
    %c0_i32_0 = arith.constant 0 : i32
    %c0_i32_1 = arith.constant 0 : i32
    return %c0_i32, %c0_i32_0 : i32, i32
  }
  func.func @transform_5(%arg0: i32, %arg1: memref<4x4xi32, #tpu.memory_space<smem>>) -> (i32, i32) {
    %c0_i32 = arith.constant 0 : i32
    %c0_i32_0 = arith.constant 0 : i32
    %c0_i32_1 = arith.constant 0 : i32
    return %c0_i32, %c0_i32_0 : i32, i32
  }
  func.func @transform_6(%arg0: i32, %arg1: memref<4x4xi32, #tpu.memory_space<smem>>) -> (i32, i32) {
    %c0_i32 = arith.constant 0 : i32
    %c0_i32_0 = arith.constant 0 : i32
    %c0_i32_1 = arith.constant 0 : i32
    return %c0_i32, %c0_i32_0 : i32, i32
  }
  func.func @transform_7(%arg0: i32, %arg1: memref<4x4xi32, #tpu.memory_space<smem>>) -> (i32, i32) {
    %c0_i32 = arith.constant 0 : i32
    %c0_i32_0 = arith.constant 0 : i32
    %c0_i32_1 = arith.constant 0 : i32
    return %c0_i32, %c0_i32_0 : i32, i32
  }
  func.func @transform_8(%arg0: i32, %arg1: memref<4x4xi32, #tpu.memory_space<smem>>) -> (i32, i32) {
    %c0_i32 = arith.constant 0 : i32
    %c0_i32_0 = arith.constant 0 : i32
    %c0_i32_1 = arith.constant 0 : i32
    return %c0_i32, %c0_i32_0 : i32, i32
  }
  func.func @transform_9(%arg0: i32, %arg1: memref<4x4xi32, #tpu.memory_space<smem>>) -> (i32, i32) {
    %c0_i32 = arith.constant 0 : i32
    %c0_i32_0 = arith.constant 0 : i32
    %c0_i32_1 = arith.constant 0 : i32
    return %c0_i32, %c0_i32_0 : i32, i32
  }
  func.func @transform_10(%arg0: i32, %arg1: memref<4x4xi32, #tpu.memory_space<smem>>) -> (i32, i32) {
    %c0_i32 = arith.constant 0 : i32
    %c0_i32_0 = arith.constant 0 : i32
    %c0_i32_1 = arith.constant 0 : i32
    return %c0_i32, %c0_i32_0 : i32, i32
  }
  func.func @transform_11(%arg0: i32, %arg1: memref<4x4xi32, #tpu.memory_space<smem>>) -> (i32, i32) {
    %c0_i32 = arith.constant 0 : i32
    %c0_i32_0 = arith.constant 0 : i32
    %c0_i32_1 = arith.constant 0 : i32
    return %c0_i32, %c0_i32_0 : i32, i32
  }
  func.func @transform_12(%arg0: i32, %arg1: memref<4x4xi32, #tpu.memory_space<smem>>) -> (i32, i32) {
    %c0_i32 = arith.constant 0 : i32
    %c0_i32_0 = arith.constant 0 : i32
    %c0_i32_1 = arith.constant 0 : i32
    return %c0_i32, %c0_i32_0 : i32, i32
  }
  func.func @transform_13(%arg0: i32, %arg1: memref<4x4xi32, #tpu.memory_space<smem>>) -> (i32, i32) {
    %c0_i32 = arith.constant 0 : i32
    %c0_i32_0 = arith.constant 0 : i32
    %c0_i32_1 = arith.constant 0 : i32
    return %c0_i32, %c0_i32_0 : i32, i32
  }
  func.func @transform_14(%arg0: i32, %arg1: memref<4x4xi32, #tpu.memory_space<smem>>) -> (i32, i32, i32) {
    %c0_i32 = arith.constant 0 : i32
    %c0_i32_0 = arith.constant 0 : i32
    %c0_i32_1 = arith.constant 0 : i32
    return %arg0, %c0_i32, %c0_i32_0 : i32, i32, i32
  }
}

</mosaic_0001>

<bundles_post_ra>
// kernel: tpu_custom_call.1
= control target key start
LH: loop header
LB: loop body
LE: loop exit
PB: predicated region body
PF: predicated region fallthrough
CT: control target
= control target key end

     0   :  { %s3909_s0 = inlined_call_operand.hbm [shape: s32[4,4], index: 0, kind: input, shape index: {}]   ;;  %s3910_s1 = inlined_call_operand.vmem [shape: f32[4,48,64], index: 1, kind: input, shape index: {}]   ;;  %s3911_s2 = inlined_call_operand.vmem [shape: f32[4,32,48], index: 2, kind: input, shape index: {}]   ;;  %s3912_s3 = inlined_call_operand.hbm [shape: f32[4,16,32], index: 3, kind: input, shape index: {}]   ;;  %s3913_s4 = inlined_call_operand.vmem [shape: f32[4,64,16], index: 4, kind: input, shape index: {}]   ;;  %s3914_s5 = inlined_call_operand.vmem [shape: bf16[16,128], index: 5, kind: input, shape index: {}]   ;;  %s3915_s6 = inlined_call_operand.vmem [shape: bf16[16,128], index: 6, kind: input, shape index: {}]   ;;  %s3916_s7 = inlined_call_operand.hbm [shape: bf16[128,128], index: 7, kind: input, shape index: {}]   ;;  %s3917_s8 = inlined_call_operand.hbm [shape: bf16[128,128], index: 8, kind: input, shape index: {}]   ;;  %s3918_s9 = inlined_call_operand.hbm [shape: bf16[128,128], index: 9, kind: input, shape index: {}]   ;;  %s3919_s10 = inlined_call_operand.hbm [shape: bf16[128,128], index: 10, kind: input, shape index: {}]   ;;  %s3920_s11 = inlined_call_operand.hbm [shape: bf16[128,128], index: 11, kind: input, shape index: {}]   ;;  %s3921_s12 = inlined_call_operand.hbm [shape: bf16[128,128], index: 12, kind: input, shape index: {}]   ;;  %s3922_s13 = inlined_call_operand.hbm [shape: bf16[128,128], index: 13, kind: input, shape index: {}]   ;;  %s3923_s14 = inlined_call_operand.vmem [shape: f32[8,128], index: 14, kind: input, shape index: {}]   ;;  %s3924_s15 = inlined_call_operand.hbm [shape: f32[4,16,128], index: 15, kind: output, shape index: {}]  }
   0x1   :  { %3930 = sst [smem:[#allocation26_spill]] %s3910_s1  ;;  %s2839_s20 = scalar_lea.hbm %s3909_s0, 64 }
   0x2   :  { %3931 = sst [smem:[#allocation27_spill]] %s3911_s2  ;;  %p2840_p0 = scmp.ne.s32.totalorder %s3909_s0, %s2839_s20 }
   0x3   :  { %3932 = sst [smem:[#allocation28_spill]] %s3914_s5  ;;  %p2843_p1 = scmp.lt.u32.totalorder %s2839_s20, %s3909_s0 }
   0x4   :  { %3933 = sst [smem:[#allocation29_spill]] %s3915_s6 }
   0x5   :  { %3934 = sst [smem:[#allocation30_spill]] %s3916_s7  ;;  %p2845_p2 = pnand %p2843_p1, %p2840_p0 }
   0x6   :  { %3935 = sst [smem:[#allocation31_spill]] %s3923_s14 }
   0x7   :  { %3936 = sst [smem:[#allocation32_spill]] %s3924_s15 }
   0x8   :  { %2848 = shalt.err (!%p2845_p2)  }
   0x9   :  { %s3161_s25 = smov [#allocation3]  }
   0xa   :  { %21 = dma.hbm_to_smem %s3909_s0, 64, %s3161_s25, [#allocation2] }
   0xb   :  { %3119 = dma.done.wait [#allocation2], 64 }
   0xc   :  { %3120 = vsyncadd [#allocation2], 4294967232 }
   0xd   :  { %23 = sfence }
   0xe   :  { %24 = vsyncpa [#allocation5], 0 }
   0xf   :  { %26 = vsyncpa [#allocation5 + $0x1], 0 }
  0x10   :  { %27 = vsyncpa [#allocation8], 0 }
  0x11   :  { %28 = vsyncpa [#allocation11], 0 }
  0x12   :  { %29 = vsyncpa [#allocation14], 0 }
  0x13   :  { %30 = vsyncpa [#allocation17], 0 }
  0x14   :  { %31 = vsyncpa [#allocation6], 0 }
  0x15   :  { %33 = vsyncpa [#allocation6 + $0x1], 0  ;;  %s3271_s28 = smov 0   ;;  %s3273_s29 = smov 0  }
  0x16   :  { %s3275_s30 = smov 0   ;;  %s3277_s16 = smov 0  }
  0x17 LB: > { %s3162_s0 = smov [#allocation7]   ;;  %s3292_s18 = sadd.s32 4294967295, %s3159_s16   ;;  %s3159_s16 = sphi %s3277_s16, %s3966_s16   ;;  %s3155_s30 = sphi %s3275_s30, %s3965_s30   ;;  %s3151_s29 = sphi %s3273_s29, %s3964_s29   ;;  %s3147_s28 = sphi %s3271_s28, %s3963_s28  }
  0x18   : > { %s402_s17 = sshll.u32 %s3162_s0, 4  ;;  %p2216_p3 = scmp.ge.s32.totalorder %s3159_s16, 1  ;;  %s3297_s17 = int_to_ptr.vmem [resolvable:$true] %s402_s17 }
  0x19   : > { %p3927_p4 = scmp.eq.s32.totalorder %s3292_s18, 0  ;;  %p384_p5 = scmp.lt.s32.totalorder %s3159_s16, 5 }
  0x1a   : > { %s3163_s20 = smov [#allocation10]   ;;  %s3164_s23 = smov [#allocation13]  }
  0x1b   : > { %p3299_p6 = pnand %p2216_p3, %p384_p5  ;;  %s428_s21 = sshll.u32 %s3163_s20, 4  ;;  %s3311_s21 = int_to_ptr.vmem [resolvable:$true] %s428_s21 }
  0x1c   : > { %s454_s24 = sshll.u32 %s3164_s23, 4  ;;  %s3939_s7 = sld [smem:[#allocation30_spill]]  ;;  %s3313_s24 = int_to_ptr.vmem [resolvable:$true] %s454_s24 }
  0x1d   : > { %s3937_s19 = scalar_select %p3299_p6, 1, 0 }
  0x1e   : > { %p2679_p7 = pneg %p3299_p6 }
  0x20   : > { %p3307_p8 = pnand %p2679_p7, %p3927_p4 }
  0x22   : > { %s2849_s27 = scalar_lea.hbm %s3939_s7, 1024  ;;  %p3323_p10 = pneg %p3307_p8 }
  0x23   : > { %p2850_p9 = scmp.ne.s32.totalorder %s3939_s7, %s2849_s27  ;;  %p2856_p13 = scmp.lt.u32.totalorder %s2849_s27, %s3939_s7 }
  0x25   : > { %p2852_p11 = pnand %p3323_p10, %p2850_p9 }
  0x27   : > { %p2853_p12 = pneg %p2852_p11 }
  0x29   : > { %p2858_p0 = pnand %p2856_p13, %p2853_p12 }
  0x2b   : > { %2861 = shalt.err (!%p2858_p0)
}
  0x2c   : > { %s2862_s15 = scalar_lea.vmem %s3297_s17, 1024  ;;  %p2870_p5 = scmp.lt.s32.totalorder %s3297_s17, %s3297_s17 }
  0x2d   : > { %p2863_p1 = scmp.ne.s32.totalorder %s3297_s17, %s2862_s15  ;;  %p2871_p7 = scmp.lt.s32.totalorder %s2862_s15, %s2862_s15 }
  0x2f   : > { %p2865_p2 = pnand %p2863_p1, %p3323_p10  ;;  %p2872_p9 = por %p2871_p7, %p2870_p5 }
  0x31   : > { %p2866_p3 = pneg %p2865_p2 }
  0x33   : > { %p2873_p11 = pnand %p2872_p9, %p2866_p3 }
  0x35   : > { %2876 = shalt.err (!%p2873_p11)
}
  0x36   : > { %s3165_s25 = smov 64   ;;  %s3166_s14 = smov 4  }
  0x37   : > { %2682 = dma.hbm_to_vmem [thread:$0]  (!%p3307_p8), %s3939_s7, 1024, %s3297_s17, [#allocation8], %s3165_s25, %s3165_s25, %s3166_s14  }
  0x38   : > { %s2877_s15 = scalar_lea.hbm %s3918_s9, 1024 }
  0x39   : > { %p2878_p12 = scmp.ne.s32.totalorder %s3918_s9, %s2877_s15  ;;  %p2884_p1 = scmp.lt.u32.totalorder %s2877_s15, %s3918_s9 }
  0x3b   : > { %p2880_p13 = pnand %p2878_p12, %p3323_p10 }
  0x3d   : > { %p2881_p0 = pneg %p2880_p13 }
  0x3f   : > { %p2886_p2 = pnand %p2884_p1, %p2881_p0 }
  0x41   : > { %2889 = shalt.err (!%p2886_p2)
}
  0x42   : > { %s2890_s17 = scalar_lea.vmem %s3311_s21, 1024  ;;  %p2898_p9 = scmp.lt.s32.totalorder %s3311_s21, %s3311_s21 }
  0x43   : > { %p2891_p3 = scmp.ne.s32.totalorder %s3311_s21, %s2890_s17  ;;  %p2899_p11 = scmp.lt.s32.totalorder %s2890_s17, %s2890_s17 }
  0x45   : > { %p2893_p5 = pnand %p2891_p3, %p3323_p10  ;;  %p2900_p12 = por %p2899_p11, %p2898_p9 }
  0x47   : > { %p2894_p7 = pneg %p2893_p5 }
  0x49   : > { %p2901_p13 = pnand %p2900_p12, %p2894_p7 }
  0x4b   : > { %2904 = shalt.err (!%p2901_p13)
}
  0x4c   : > { %2688 = dma.hbm_to_vmem [thread:$0]  (!%p3307_p8), %s3918_s9, 1024, %s3311_s21, [#allocation11], %s3165_s25, %s3165_s25, %s3166_s14  }
  0x4d   : > { %s2905_s26 = scalar_lea.hbm %s3920_s11, 1024 }
  0x4e   : > { %p2906_p0 = scmp.ne.s32.totalorder %s3920_s11, %s2905_s26  ;;  %p2912_p3 = scmp.lt.u32.totalorder %s2905_s26, %s3920_s11 }
  0x50   : > { %p2908_p1 = pnand %p2906_p0, %p3323_p10 }
  0x52   : > { %p2909_p2 = pneg %p2908_p1 }
  0x54   : > { %p2914_p5 = pnand %p2912_p3, %p2909_p2 }
  0x56   : > { %2917 = shalt.err (!%p2914_p5)
}
  0x57   : > { %s2918_s21 = scalar_lea.vmem %s3313_s24, 1024  ;;  %p2926_p12 = scmp.lt.s32.totalorder %s3313_s24, %s3313_s24 }
  0x58   : > { %p2919_p7 = scmp.ne.s32.totalorder %s3313_s24, %s2918_s21  ;;  %p2927_p13 = scmp.lt.s32.totalorder %s2918_s21, %s2918_s21 }
  0x5a   : > { %p2921_p9 = pnand %p2919_p7, %p3323_p10  ;;  %p2928_p0 = por %p2927_p13, %p2926_p12 }
  0x5c   : > { %p2922_p11 = pneg %p2921_p9 }
  0x5e   : > { %p2929_p1 = pnand %p2928_p0, %p2922_p11 }
  0x60   : > { %2932 = shalt.err (!%p2929_p1)
}
  0x61   : > { %2694 = dma.hbm_to_vmem [thread:$0]  (!%p3307_p8), %s3920_s11, 1024, %s3313_s24, [#allocation14], %s3165_s25, %s3165_s25, %s3166_s14  }
  0x62   : > { %s3167_s2 = smov [#allocation9]   ;;  %s3168_s6 = smov [#allocation12]  }
  0x63   : > { %s415_s5 = sshll.u32 %s3167_s2, 4  ;;  %s441_s26 = sshll.u32 %s3168_s6, 4  ;;  %s416_s5 = int_to_ptr.vmem [resolvable:$true] %s415_s5  ;;  %s442_s26 = int_to_ptr.vmem [resolvable:$true] %s441_s26 }
  0x64   : > { %s2933_s23 = scalar_lea.hbm %s3917_s8, 1024 }
  0x65   : > { %p2934_p2 = scmp.ne.s32.totalorder %s3917_s8, %s2933_s23  ;;  %p2940_p7 = scmp.lt.u32.totalorder %s2933_s23, %s3917_s8 }
  0x67   : > { %p2936_p3 = pnand %p2934_p2, %p3323_p10 }
  0x69   : > { %p2937_p5 = pneg %p2936_p3 }
  0x6b   : > { %p2942_p9 = pnand %p2940_p7, %p2937_p5 }
  0x6d   : > { %2945 = shalt.err (!%p2942_p9)
}
  0x6e   : > { %s2946_s24 = scalar_lea.vmem %s416_s5, 1024  ;;  %p2954_p0 = scmp.lt.s32.totalorder %s416_s5, %s416_s5 }
  0x6f   : > { %p2947_p11 = scmp.ne.s32.totalorder %s416_s5, %s2946_s24  ;;  %p2955_p1 = scmp.lt.s32.totalorder %s2946_s24, %s2946_s24 }
  0x71   : > { %p2949_p12 = pnand %p2947_p11, %p3323_p10  ;;  %p2956_p4 = por %p2955_p1, %p2954_p0 }
  0x73   : > { %p2950_p13 = pneg %p2949_p12 }
  0x75   : > { %p2957_p6 = pnand %p2956_p4, %p2950_p13 }
  0x77   : > { %2960 = shalt.err (!%p2957_p6)
}
  0x78   : > { %2685 = dma.hbm_to_vmem [thread:$0]  (!%p3307_p8), %s3917_s8, 1024, %s416_s5, [#allocation8], %s3165_s25, %s3165_s25, %s3166_s14  }
  0x79   : > { %s2961_s27 = scalar_lea.hbm %s3919_s10, 1024 }
  0x7a   : > { %p2962_p4 = scmp.ne.s32.totalorder %s3919_s10, %s2961_s27  ;;  %p2968_p3 = scmp.lt.u32.totalorder %s2961_s27, %s3919_s10 }
  0x7c   : > { %p2964_p6 = pnand %p2962_p4, %p3323_p10 }
  0x7e   : > { %p2965_p2 = pneg %p2964_p6 }
  0x80   : > { %p2970_p5 = pnand %p2968_p3, %p2965_p2 }
  0x82   : > { %2973 = shalt.err (!%p2970_p5)
}
  0x83   : > { %s2974_s17 = scalar_lea.vmem %s442_s26, 1024  ;;  %p2982_p12 = scmp.lt.s32.totalorder %s442_s26, %s442_s26 }
  0x84   : > { %p2975_p7 = scmp.ne.s32.totalorder %s442_s26, %s2974_s17  ;;  %p2983_p13 = scmp.lt.s32.totalorder %s2974_s17, %s2974_s17 }
  0x86   : > { %p2977_p9 = pnand %p2975_p7, %p3323_p10  ;;  %p2984_p0 = por %p2983_p13, %p2982_p12 }
  0x88   : > { %p2978_p11 = pneg %p2977_p9 }
  0x8a   : > { %p2985_p1 = pnand %p2984_p0, %p2978_p11 }
  0x8c   : > { %2988 = shalt.err (!%p2985_p1)
}
  0x8d   : > { %2691 = dma.hbm_to_vmem [thread:$0]  (!%p3307_p8), %s3919_s10, 1024, %s442_s26, [#allocation11], %s3165_s25, %s3165_s25, %s3166_s14  }
  0x8e   : > { %s3169_s7 = smov [#allocation15]   ;;  %s3170_s2 = smov [#allocation16]  }
  0x8f   : > { %s467_s1 = sshll.u32 %s3169_s7, 4  ;;  %s480_s6 = sshll.u32 %s3170_s2, 4  ;;  %s468_s1 = int_to_ptr.vmem [resolvable:$true] %s467_s1  ;;  %s481_s6 = int_to_ptr.vmem [resolvable:$true] %s480_s6 }
  0x90   : > { %s2989_s23 = scalar_lea.hbm %s3921_s12, 1024 }
  0x91   : > { %p2990_p4 = scmp.ne.s32.totalorder %s3921_s12, %s2989_s23  ;;  %p2996_p3 = scmp.lt.u32.totalorder %s2989_s23, %s3921_s12 }
  0x93   : > { %p2992_p6 = pnand %p2990_p4, %p3323_p10 }
  0x95   : > { %p2993_p2 = pneg %p2992_p6 }
  0x97   : > { %p2998_p5 = pnand %p2996_p3, %p2993_p2 }
  0x99   : > { %3001 = shalt.err (!%p2998_p5)
}
  0x9a   : > { %s3002_s26 = scalar_lea.vmem %s468_s1, 1024  ;;  %p3010_p12 = scmp.lt.s32.totalorder %s468_s1, %s468_s1 }
  0x9b   : > { %p3003_p7 = scmp.ne.s32.totalorder %s468_s1, %s3002_s26  ;;  %p3011_p13 = scmp.lt.s32.totalorder %s3002_s26, %s3002_s26 }
  0x9d   : > { %p3005_p9 = pnand %p3003_p7, %p3323_p10  ;;  %p3012_p0 = por %p3011_p13, %p3010_p12 }
  0x9f   : > { %p3006_p11 = pneg %p3005_p9 }
  0xa1   : > { %p3013_p1 = pnand %p3012_p0, %p3006_p11 }
  0xa3   : > { %3016 = shalt.err (!%p3013_p1)
}
  0xa4   : > { %2697 = dma.hbm_to_vmem [thread:$0]  (!%p3307_p8), %s3921_s12, 1024, %s468_s1, [#allocation14], %s3165_s25, %s3165_s25, %s3166_s14  }
  0xa5   : > { %s3017_s0 = scalar_lea.hbm %s3922_s13, 1024 }
  0xa6   : > { %p3018_p4 = scmp.ne.s32.totalorder %s3922_s13, %s3017_s0  ;;  %p3024_p3 = scmp.lt.u32.totalorder %s3017_s0, %s3922_s13 }
  0xa8   : > { %p3020_p6 = pnand %p3018_p4, %p3323_p10 }
  0xaa   : > { %p3021_p2 = pneg %p3020_p6 }
  0xac   : > { %p3026_p5 = pnand %p3024_p3, %p3021_p2 }
  0xae   : > { %3029 = shalt.err (!%p3026_p5)
}
  0xaf   : > { %s3030_s5 = scalar_lea.vmem %s481_s6, 1024  ;;  %p3038_p12 = scmp.lt.s32.totalorder %s481_s6, %s481_s6 }
  0xb0   : > { %p3031_p7 = scmp.ne.s32.totalorder %s481_s6, %s3030_s5  ;;  %p3039_p13 = scmp.lt.s32.totalorder %s3030_s5, %s3030_s5 }
  0xb2   : > { %p3033_p9 = pnand %p3031_p7, %p3323_p10  ;;  %p3040_p0 = por %p3039_p13, %p3038_p12 }
  0xb4   : > { %p3034_p11 = pneg %p3033_p9 }
  0xb6   : > { %p3041_p1 = pnand %p3040_p0, %p3034_p11 }
  0xb8   : > { %3044 = shalt.err (!%p3041_p1)
}
  0xb9   : > { %2700 = dma.hbm_to_vmem [thread:$0]  (!%p3307_p8), %s3922_s13, 1024, %s481_s6, [#allocation17], %s3165_s25, %s3165_s25, %s3166_s14  }
  0xba   : > { %s2215_s22 = sadd.s32 4294967294, %s3159_s16   ;;  %s3485_s20 = sadd.s32 1, %s3159_s16  }
  0xbb   : > { %s98_s24 = sadd.s32 1, %s3155_s30  ;;  %s95_s7 = ssub.s32 %s3159_s16, %s3485_s20 }
  0xbc   : > { %p105_p10 = scmp.ne.s32.totalorder %s3155_s30, %s3151_s29  ;;  %p96_p4 = scmp.eq.s32.totalorder %s95_s7, 0 }
  0xbd   : > { %p106_p6 = scmp.eq.s32.totalorder %s3159_s16, 0  ;;  %p111_p2 = scmp.ne.s32.totalorder %s3151_s29, %s3147_s28 }
  0xbe   : > { %p371_p3 = scmp.eq.s32.totalorder %s3292_s18, 3  ;;  %p3941_p7 = scmp.eq.s32.totalorder %s3292_s18, 0 }
  0xbf   : > { %s3497_s2 = scalar_select %p96_p4, %s3155_s30, %s98_s24  }
  0xc0   : > { %p107_p5 = por %p106_p6, %p105_p10  ;;  %p3501_p9 = por %p3941_p7, %p111_p2 }
  0xc1   : > { %p3505_p8 = por %p371_p3, %p105_p10  ;;  %p377_p11 = scmp.eq.s32.totalorder %s2215_s22, 3 }
  0xc2   : > { %p2716_p12 = scmp.lt.s32.totalorder %s3159_s16, 4  ;;  %s513_s14 = sand.u32 1, %s3155_s30  }
  0xc3   : > { %s3943_s25 = scalar_select %p3505_p8, 1, 0 }
  0xc4   : > { %p3511_p13 = por %p377_p11, %p111_p2  ;;  %s2225_s0 = sshll.u32 %s513_s14, 4 }
  0xc5   : > { %s2338_s23 = sshll.u32 %s3159_s16, 8  ;;  %s517_s5 = scalar_lea.vmem [#allocation4], %s2225_s0 }
  0xc6   : > { %s3944_s6 = scalar_select %p3511_p13, 1, 0 }
  0xc7   : > { %s3519_s17 = scalar_lea.hbm %s3912_s3, %s2338_s23  ;;  %s524_s1 = sshll.u32 %s517_s5, 4  ;;  %s3525_s1 = int_to_ptr.vmem [resolvable:$true] %s524_s1 }
  0xc8   : > { %p3521_p0 = pnand %p2716_p12, %p107_p5  ;;  %s3527_s22 = scalar_lea.sflag [#allocation5], %s513_s14 }
  0xc9   : > { %s3045_s24 = scalar_lea.hbm %s3519_s17, 256  ;;  %s3050_s23 = scalar_lea.hbm %s3912_s3, 1024 }
  0xca   : > { %p3046_p1 = scmp.ne.s32.totalorder %s3519_s17, %s3045_s24  ;;  %p3047_p10 = pneg %p3521_p0 }
  0xcb   : > { %p3051_p2 = scmp.lt.u32.totalorder %s3519_s17, %s3912_s3  ;;  %p3052_p3 = scmp.lt.u32.totalorder %s3050_s23, %s3045_s24 }
  0xcc   : > { %p3048_p4 = pnand %p3047_p10, %p3046_p1  ;;  %p3054_p7 = scmp.lt.u32.totalorder %s3045_s24, %s3519_s17 }
  0xcd   : > { %p3053_p5 = por %p3052_p3, %p3051_p2 }
  0xce   : > { %p3049_p6 = pneg %p3048_p4 }
  0xcf   : > { %p3055_p11 = por %p3054_p7, %p3053_p5 }
  0xd1   : > { %p3056_p12 = pnand %p3055_p11, %p3049_p6 }
  0xd3   : > { %3059 = shalt.err (!%p3056_p12)
}
  0xd4   : > { %s3060_s14 = scalar_lea.vmem %s3525_s1, 256  ;;  %s3171_s5 = smov [#allocation4]  }
  0xd5   : > { %p3061_p1 = scmp.ne.s32.totalorder %s3525_s1, %s3060_s14  ;;  %s3065_s7 = sshll.u32 %s3171_s5, 4  ;;  %s3066_s7 = int_to_ptr.vmem [resolvable:$false] %s3065_s7 }
  0xd6   : > { %s3067_s0 = scalar_lea.vmem %s3066_s7, 512  ;;  %p3068_p8 = scmp.lt.s32.totalorder %s3525_s1, %s3066_s7 }
  0xd7   : > { %p3063_p4 = pnand %p3061_p1, %p3047_p10  ;;  %p3069_p2 = scmp.lt.s32.totalorder %s3067_s0, %s3060_s14 }
  0xd9   : > { %p3064_p13 = pneg %p3063_p4  ;;  %p3070_p3 = por %p3069_p2, %p3068_p8 }
  0xdb   : > { %p3071_p5 = pnand %p3070_p3, %p3064_p13 }
  0xdd   : > { %3074 = shalt.err (!%p3071_p5)
}
  0xde   : > { %s3172_s24 = smov 128   ;;  %s3173_s23 = smov 8  }
  0xdf   : > { %2704 = dma.hbm_to_vmem [thread:$0]  (!%p3521_p0), %s3519_s17, 256, %s3525_s1, %s3527_s22, %s3172_s24, %s3172_s24, %s3173_s23  }
  0xe0   : > { %p3946_p10 = scmp.ne.s32.totalorder %s3937_s19, 0 }
  0xe1   : > { %s3558_s15 = sand.u32 (!%p3946_p10), 1, %s3151_s29  }
  0xe2   : > { %544 = sbr.rel (%p3946_p10) target bundleno = 2475 (0x9ab), region = 76  ;;  %s2229_s21 = sshll.u32 (!%p3946_p10), %s3558_s15, 4 }
  0xe3   : > { %s547_s14 = scalar_lea.sflag (!%p3946_p10), [#allocation5], %s3558_s15  ;;  %s3564_s5 = scalar_lea.vmem (!%p3946_p10), [#allocation4], %s2229_s21 }
  0xe9   : > { %3122 = dma.done.wait (%p3501_p9), %s547_s14, 256  }
  0xea   : > { %3124 = vsyncadd (%p3501_p9), %s547_s14, 4294967040  ;;  %p3947_p8 = scmp.eq.s32.totalorder %s3292_s18, 0 }
  0xec   : > { %3126 = dma.done.wait (%p3947_p8), [#allocation8], 2048   ;;  %p3948_p13 = pmov %p3947_p8 }
  0xed   : > { %p3949_p0 = pmov %p3947_p8 }
  0xee   : > { %3128 = vsyncadd (%p3948_p13), [#allocation8], 4294965248 }
  0xef   : > { %3130 = dma.done.wait (%p3949_p0), [#allocation11], 2048   ;;  %p3950_p6 = pmov %p3949_p0 }
  0xf0   : > { %p3951_p7 = pmov %p3949_p0 }
  0xf1   : > { %3132 = vsyncadd (%p3950_p6), [#allocation11], 4294965248 }
  0xf2   : > { %3134 = dma.done.wait (%p3951_p7), [#allocation14], 2048   ;;  %p3952_p11 = pmov %p3949_p0 }
  0xf3   : > { %p3953_p9 = pmov %p3949_p0 }
  0xf4   : > { %3136 = vsyncadd (%p3952_p11), [#allocation14], 4294965248 }
  0xf5   : > { %3138 = dma.done.wait (%p3953_p9), [#allocation17], 1024   ;;  %p3954_p12 = pmov %p3949_p0 }
  0xf6   : > { %p638_p1 = scmp.lt.s32.totalorder %s3292_s18, 3  ;;  %v3174_v0 = vmov 0.0   ;;  %vm3175_vm0 = vmmov 0   ;;  %s3955_s24 = sld [smem:[#allocation26_spill]]  ;;  %vm685_vm1 = vcmask 523264   ;;  %vm765_vm2 = vcmask 130048  }
  0xf7   : > { %3140 = vsyncadd (%p3954_p12), [#allocation17], 4294966272  ;;  %2430 = vmatprep.subr.bf16.mxu0 %v3174_v0  ;;  %2438 = vmatprep.mubr.msk.bf16.mxu0 %vm3175_vm0, %v3174_v0  ;;  %s3956_s17 = sld [smem:[#allocation29_spill]]  ;;  %s3638_s7 = sshll.u32 %s3292_s18, 7  ;;  %vm1040_vm3 = vcmask 392192   ;;  %v2775_v44 = vld [vmem:[#allocation9] sm:$0xff]   ;;  %v914_v59 = vlaneseq }
  0xf8   : > { %s3591_s19 = scalar_select %p638_p1, %s3292_s18, 3  ;;  %2450 = vmatprep.subr.bf16.mxu1 %v3174_v0  ;;  %2452 = vmatprep.mubr.msk.bf16.mxu1 %vm3175_vm0, %v3174_v0  ;;  %v2776_v45 = vld [vmem:[#allocation9 + $0x8] sm:$0xff]   ;;  %v2777_v46 = vld [vmem:[#allocation9 + $0x10] sm:$0xff]   ;;  %v2778_v47 = vld [vmem:[#allocation9 + $0x18] sm:$0xff]   ;;  %vm1413_vm14 = vcmask 261120  }
  0xf9   : > { %s657_s0 = sadd.s32 1, %s3638_s7  ;;  %s3958_s1 = sld [smem:[#allocation27_spill]]  ;;  %v2779_v48 = vld [vmem:[#allocation9 + $0x20] sm:$0xff]   ;;  %v2780_v49 = vld [vmem:[#allocation9 + $0x28] sm:$0xff]   ;;  %v2781_v51 = vld [vmem:[#allocation9 + $0x30] sm:$0xff]   ;;  %v3653_v62 = vshrl.u32 %v914_v59, 7 }
  0xfa   : > { %s2340_s27 = sshll.u32 %s3591_s19, 6  ;;  %s2640_s22 = smul.u32 48, %s3591_s19 }
  0xfb   : > { %s652_s26 = scalar_lea.vmem %s3913_s4, %s2340_s27  ;;  %s2339_s14 = sshll.u32 %s3591_s19, 5 }
  0xfc   : > { %v663_v1 = vld [vmem:[%s652_s26] sm:$0xff]  ;;  %v664_v2 = vld [vmem:[%s652_s26 + $0x8] sm:$0xff]  ;;  %v665_v3 = vld [vmem:[%s652_s26 + $0x10] sm:$0xff]  ;;  %s642_s23 = scalar_lea.vmem %s3955_s24, %s2640_s22  ;;  %s3957_s22 = sld [smem:[#allocation28_spill]] }
  0xfd   : > { %v671_v4 = vpack.c.bf16 %v664_v2, %v663_v1  ;;  %v666_v5 = vld [vmem:[%s652_s26 + $0x18] sm:$0xff]  ;;  %v667_v7 = vld [vmem:[%s652_s26 + $0x20] sm:$0xff]  ;;  %v668_v8 = vld [vmem:[%s652_s26 + $0x28] sm:$0xff]  ;;  %s3641_s24 = sld [smem:[#allocation3 + %s657_s0]]  ;;  %s2341_s27 = sshll.u32 %s3292_s18, 8 }
  0xfe   : > { %v672_v6 = vpack.c.bf16 %v666_v5, %v665_v3  ;;  %v669_v9 = vld [vmem:[%s652_s26 + $0x30] sm:$0xff]  ;;  %v670_v10 = vld [vmem:[%s652_s26 + $0x38] sm:$0xff]  ;;  %v673_v11 = vpack.c.bf16 %v668_v8, %v667_v7  ;;  %v676_v12 = vld [vmem:[%s642_s23] sm:$0xff]  ;;  %v3657_v3 = vadd.s32 8, %v3653_v62  ;;  %s3959_s0 = sld [smem:[#allocation31_spill]]  ;;  %s2026_s18 = scalar_lea.sflag [#allocation6], %s3558_s15 }
  0xff   : > { %2431 = vmatpush3.bf16.msra.mxu0 %v671_v4  ;;  %v677_v13 = vld [vmem:[%s642_s23 + $0x8] sm:$0xff]  ;;  %v674_v14 = vpack.c.bf16 %v670_v10, %v669_v9  ;;  %v678_v16 = vld [vmem:[%s642_s23 + $0x10] sm:$0xff]  ;;  %v679_v17 = vld [vmem:[%s642_s23 + $0x18] sm:$0xff]  ;;  %s3648_s26 = scalar_lea.vmem %s3958_s1, %s2339_s14  ;;  %s659_s1 = sadd.s32 2, %s3638_s7 }
 0x100   : > { %2432 = vmatprep.subr.bf16.mxu0 %v3174_v0  ;;  %v682_v15 = vpack.c.bf16 %v677_v13, %v676_v12  ;;  %v683_v18 = vpack.c.bf16 %v679_v17, %v678_v16  ;;  %v680_v19 = vld [vmem:[%s642_s23 + $0x20] sm:$0xff]  ;;  %v681_v20 = vld [vmem:[%s642_s23 + $0x28] sm:$0xff]  ;;  %v3668_v13 = vadd.s32 16, %v3653_v62  ;;  %s3745_s19 = sld [smem:[#allocation3 + %s659_s1]]  ;;  %p3961_p2 = scmp.ne.s32.totalorder %s3943_s25, 0 }
 0x101   : > { %v684_v21 = vpack.c.bf16 %v681_v20, %v680_v19  ;;  %v2773_v22 = vld [vmem:[%s3956_s17] sm:$0xff]   ;;  %v1035_v42 = vld [vmem:[%s3648_s26 + $0x8] sm:$0xff]  ;;  %s3960_s1 = sld [smem:[#allocation32_spill]] }
 0x102   : > { %2451 = vmatpush3.bf16.msra.mxu1 %v2773_v22  ;;  %v2774_v26 = vld [vmem:[%s3957_s22] sm:$0xff]  }
 0x103   : > { %2433 = vmatpush3.bf16.msra.mxu0 %v672_v6  ;;  %2464 = vmatprep.subr.bf16.mxu1 %v3174_v0  ;;  %s946_s23 = scvt.s32.f32 %s3641_s24  ;;  %v1034_v41 = vld [vmem:[%s3648_s26] sm:$0xff]  ;;  %v921_v2 = vstv %s3641_s24 }
 0x104   : > { %2434 = vmatprep.subr.bf16.mxu0 %v3174_v0  ;;  %v1038_v43 = vpack.c.bf16 %v1035_v42, %v1034_v41  ;;  %vm922_vm4 = vcmp.lt.s32.totalorder %v3653_v62, %v921_v2  ;;  %vm923_vm5 = vcmp.lt.s32.totalorder %v3657_v3, %v921_v2  ;;  %vm924_vm6 = vcmp.lt.s32.totalorder %v3668_v13, %v921_v2 }
 0x105   : > { %v947_v39 = vstv %s946_s23  ;;  %v3665_v8 = vsel %vm922_vm4, 1.0, %v3174_v0 }
 0x106   : > { %2831 = vrcp.f32 %v947_v39 }
 0x107   : > { %2435 = vmatpush3.bf16.msra.mxu0 %v673_v11 }
 0x108   : > { %2436 = vmatprep.subr.bf16.mxu0 %v3174_v0 }
 0x10b   : > { %2437 = vmatpush3.bf16.msra.mxu0 %v674_v14  ;;  %v3671_v14 = vsel %vm923_vm5, 1.0, %v3174_v0 }
 0x10e   : > { %2439 = vmatmul.mubr.msk.bf16.vlgmr.msra.gmra.mrb[0].mxu0 %vm685_vm1, %v682_v15  ;;  %v3674_v15 = vadd.s32 24, %v3653_v62 }
 0x10f   : > { %2442 = vmatprep.mubr.msk.bf16.mxu0 %vm3175_vm0, %v3174_v0 }
 0x110   : > { %v2832_v40 = vpop.eup %2831  ;;  %vm925_vm7 = vcmp.lt.s32.totalorder %v3674_v15, %v921_v2 }
 0x111   : > { %2641 = vpush %v2832_v40 }
 0x116   : > { %2443 = vmatmul.mubr.msk.bf16.gmra.mrb[4].mxu0 %vm685_vm1, %v683_v18 }
 0x117   : > { %2446 = vmatprep.mubr.msk.bf16.mxu0 %vm3175_vm0, %v3174_v0 }
 0x11e   : > { %2447 = vmatmul.mubr.msk.bf16.gmra.mrb[8].mxu0 %vm685_vm1, %v684_v21 }
 0x11f   : > { %2484 = vmatprep.mubr.msk.bf16.mxu0 %vm1040_vm3, %v1038_v43 }
 0x142   : > { %s2642_s24 = spop %2641 }
 0x1e1   : > { %v729_v23 = vpop.f32.mrb[0].mxu0 }
 0x1e2   : > { %v2440_v24 = vpop.f32.mrb[1].mxu0 }
 0x1e3   : > { %v732_v25 = vpop.f32.mrb[2].mxu0 }
 0x1e4   : > { %v754_v27 = vpack.c.bf16 %v732_v25, %v729_v23  ;;  %v2441_v28 = vpop.f32.mrb[3].mxu0  ;;  %v3691_v25 = vsel %vm924_vm6, 1.0, %v3174_v0 }
 0x1e6   : > { %2453 = vmatmul.mubr.msk.bf16.vlgmr.msra.gmra.mrb[0].mxu1 %vm765_vm2, %v754_v27 }
 0x1e7   : > { %2456 = vmatprep.mubr.msk.bf16.mxu1 %vm3175_vm0, %v3174_v0  ;;  %2465 = vmatpush3.bf16.msra.mxu1 %v2774_v26 }
 0x1e8   : > { %2488 = vmatprep.subr.bf16.mxu1 %v2775_v44 }
 0x1e9   : > { %v737_v29 = vpop.f32.mrb[4].mxu0 }
 0x1ea   : > { %v2444_v30 = vpop.f32.mrb[5].mxu0 }
 0x1eb   : > { %v740_v31 = vpop.f32.mrb[6].mxu0 }
 0x1ec   : > { %v755_v32 = vpack.c.bf16 %v740_v31, %v737_v29  ;;  %v2445_v33 = vpop.f32.mrb[7].mxu0  ;;  %v919_v31 = vadd.s32 32, %v3653_v62 }
 0x1ed   : > { %v920_v33 = vadd.s32 40, %v3653_v62 }
 0x1ee   : > { %2457 = vmatmul.mubr.msk.bf16.gmra.mrb[4].mxu1 %vm765_vm2, %v755_v32  ;;  %v3695_v32 = vsel %vm925_vm7, 1.0, %v3174_v0  ;;  %vm926_vm8 = vcmp.lt.s32.totalorder %v919_v31, %v921_v2 }
 0x1ef   : > { %2460 = vmatprep.mubr.msk.bf16.mxu1 %vm3175_vm0, %v3174_v0  ;;  %vm927_vm9 = vcmp.lt.s32.totalorder %v920_v33, %v921_v2 }
 0x1f1   : > { %v745_v34 = vpop.f32.mrb[8].mxu0 }
 0x1f2   : > { %v2448_v35 = vpop.f32.mrb[9].mxu0 }
 0x1f3   : > { %v748_v36 = vpop.f32.mrb[10].mxu0 }
 0x1f4   : > { %v756_v37 = vpack.c.bf16 %v748_v36, %v745_v34  ;;  %v2449_v38 = vpop.f32.mrb[11].mxu0 }
 0x1f6   : > { %2461 = vmatmul.mubr.msk.bf16.gmra.mrb[8].mxu1 %vm765_vm2, %v756_v37 }
 0x1f7   : > { %2466 = vmatprep.mubr.msk.bf16.mxu1 %vm3175_vm0, %v3174_v0 }
 0x1fe   : > { %2467 = vmatmul.mubr.msk.bf16.vlgmr.msra.gmra.mrb[12].mxu1 %vm765_vm2, %v671_v4  ;;  %v2255_v4 = vld [vmem:[%s3959_s0] ss:$0 sm:$0xff] }
 0x1ff   : > { %2470 = vmatprep.mubr.msk.bf16.mxu1 %vm3175_vm0, %v3174_v0  ;;  %2489 = vmatpush3.bf16.msra.mxu1 %v2775_v44 }
 0x200   : > { %2490 = vmatprep.subr.bf16.mxu1 %v2776_v45 }
 0x203   : > { %2491 = vmatpush3.bf16.msra.mxu1 %v2776_v45  ;;  %v3701_v45 = vsel %vm926_vm8, 1.0, %v3174_v0 }
 0x204   : > { %2492 = vmatprep.subr.bf16.mxu1 %v2777_v46 }
 0x206   : > { %2471 = vmatmul.mubr.msk.bf16.gmra.mrb[16].mxu1 %vm765_vm2, %v672_v6 }
 0x207   : > { %2474 = vmatprep.mubr.msk.bf16.mxu1 %vm3175_vm0, %v3174_v0  ;;  %2493 = vmatpush3.bf16.msra.mxu1 %v2777_v46 }
 0x208   : > { %2494 = vmatprep.subr.bf16.mxu1 %v2778_v47 }
 0x20b   : > { %2495 = vmatpush3.bf16.msra.mxu1 %v2778_v47 }
 0x20c   : > { %2496 = vmatprep.subr.bf16.mxu1 %v2779_v48 }
 0x20e   : > { %2475 = vmatmul.mubr.msk.bf16.gmra.mrb[20].mxu1 %vm765_vm2, %v673_v11 }
 0x20f   : > { %2497 = vmatpush3.bf16.msra.mxu1 %v2779_v48 }
 0x210   : > { %2498 = vmatprep.subr.bf16.mxu1 %v2780_v49 }
 0x213   : > { %2499 = vmatpush3.bf16.msra.mxu1 %v2780_v49 }
 0x214   : > { %2500 = vmatprep.subr.bf16.mxu1 %v2781_v51 }
 0x217   : > { %2501 = vmatpush3.bf16.msra.mxu1 %v2781_v51  ;;  %v3704_v51 = vsel %vm927_vm9, 1.0, %v3174_v0 }
 0x2b9   : > { %v809_v50 = vpop.f32.mrb[0].mxu1 }
 0x2ba   : > { %v2454_v52 = vpop.f32.mrb[1].mxu1 }
 0x2bb   : > { %v812_v53 = vpop.f32.mrb[2].mxu1 }
 0x2bc   : > { %v2455_v54 = vpop.f32.mrb[3].mxu1 }
 0x2c1   : > { %v817_v55 = vpop.f32.mrb[4].mxu1 }
 0x2c2   : > { %v2458_v56 = vpop.f32.mrb[5].mxu1 }
 0x2c3   : > { %v820_v57 = vpop.f32.mrb[6].mxu1 }
 0x2c4   : > { %v2459_v58 = vpop.f32.mrb[7].mxu1 }
 0x2c9   : > { %v825_v60 = vpop.f32.mrb[8].mxu1 }
 0x2ca   : > { %v2462_v61 = vpop.f32.mrb[9].mxu1 }
 0x2cb   : > { %v828_v63 = vpop.f32.mrb[10].mxu1 }
 0x2cc   : > { %v2463_v1 = vpop.f32.mrb[11].mxu1 }
 0x2d1   : > { %v881_v5 = vpop.f32.mrb[12].mxu1 }
 0x2d2   : > { %v882_v6 = vadd.f32 %v881_v5, %v809_v50  ;;  %v2468_v7 = vpop.f32.mrb[13].mxu1 }
 0x2d3   : > { %v884_v9 = vpop.f32.mrb[14].mxu1 }
 0x2d4   : > { %v908_v10 = vadd.f32 %v2255_v4, %v882_v6  ;;  %v885_v11 = vadd.f32 %v884_v9, %v812_v53  ;;  %v2469_v12 = vpop.f32.mrb[15].mxu1 }
 0x2d6   : > { %v3677_v16 = vmul.f32 %v3665_v8, %v908_v10  ;;  %v909_v17 = vadd.f32 %v2255_v4, %v885_v11  ;;  %v978_v11 = vstv %s2642_s24 }
 0x2d8   : > { %v3680_v18 = vmul.f32 %v3671_v14, %v909_v17  ;;  %v961_v20 = vmul.f32 %v3677_v16, %v3677_v16 }
 0x2d9   : > { %v889_v19 = vpop.f32.mrb[16].mxu1 }
 0x2da   : > { %v950_v21 = vadd.f32 %v3680_v18, %v3677_v16  ;;  %v962_v22 = vmul.f32 %v3680_v18, %v3680_v18  ;;  %v890_v23 = vadd.f32 %v889_v19, %v817_v55  ;;  %v2472_v24 = vpop.f32.mrb[17].mxu1 }
 0x2db   : > { %v892_v26 = vpop.f32.mrb[18].mxu1 }
 0x2dc   : > { %v967_v27 = vadd.f32 %v962_v22, %v961_v20  ;;  %v910_v28 = vadd.f32 %v2255_v4, %v890_v23  ;;  %v893_v29 = vadd.f32 %v892_v26, %v820_v57  ;;  %v2473_v30 = vpop.f32.mrb[19].mxu1 }
 0x2de   : > { %v942_v34 = vmul.f32 %v3691_v25, %v910_v28  ;;  %v911_v35 = vadd.f32 %v2255_v4, %v893_v29 }
 0x2e0   : > { %v951_v36 = vadd.f32 %v950_v21, %v942_v34  ;;  %v963_v37 = vmul.f32 %v942_v34, %v942_v34  ;;  %v943_v38 = vmul.f32 %v3695_v32, %v911_v35  ;;  %v3713_v35 = vld [vmem:[%s3959_s0 + $0x3] ss:$0 sm:$0xff] }
 0x2e1   : > { %v897_v39 = vpop.f32.mrb[20].mxu1 }
 0x2e2   : > { %v968_v40 = vadd.f32 %v967_v27, %v963_v37  ;;  %v952_v41 = vadd.f32 %v951_v36, %v943_v38  ;;  %v964_v42 = vmul.f32 %v943_v38, %v943_v38  ;;  %v898_v43 = vadd.f32 %v897_v39, %v825_v60  ;;  %v2476_v44 = vpop.f32.mrb[21].mxu1 }
 0x2e3   : > { %v900_v46 = vpop.f32.mrb[22].mxu1 }
 0x2e4   : > { %v969_v47 = vadd.f32 %v968_v40, %v964_v42  ;;  %v912_v48 = vadd.f32 %v2255_v4, %v898_v43  ;;  %v901_v49 = vadd.f32 %v900_v46, %v828_v63  ;;  %v2477_v50 = vpop.f32.mrb[23].mxu1 }
 0x2e6   : > { %v944_v52 = vmul.f32 %v3701_v45, %v912_v48  ;;  %v913_v53 = vadd.f32 %v2255_v4, %v901_v49 }
 0x2e8   : > { %v953_v54 = vadd.f32 %v952_v41, %v944_v52  ;;  %v965_v55 = vmul.f32 %v944_v52, %v944_v52  ;;  %v945_v56 = vmul.f32 %v3704_v51, %v913_v53 }
 0x2ea   : > { %v970_v57 = vadd.f32 %v969_v47, %v965_v55  ;;  %v954_v58 = vadd.f32 %v953_v54, %v945_v56  ;;  %v966_v59 = vmul.f32 %v945_v56, %v945_v56 }
 0x2ec   : > { %v955_v60 = vrot.slane %v954_v58, 4  ;;  %v971_v61 = vadd.f32 %v970_v57, %v966_v59 }
 0x2ee   : > { %v956_v1 = vadd.f32 %v955_v60, %v954_v58  ;;  %v972_v2 = vrot.slane %v971_v61, 4 }
 0x2f0   : > { %v957_v5 = vrot.slane %v956_v1, 2  ;;  %v973_v63 = vadd.f32 %v972_v2, %v971_v61 }
 0x2f2   : > { %v958_v6 = vadd.f32 %v957_v5, %v956_v1  ;;  %v974_v7 = vrot.slane %v973_v63, 2 }
 0x2f4   : > { %v959_v9 = vrot.slane %v958_v6, 1  ;;  %v975_v10 = vadd.f32 %v974_v7, %v973_v63 }
 0x2f6   : > { %v960_v4 = vadd.f32 %v959_v9, %v958_v6  ;;  %v976_v12 = vrot.slane %v975_v10, 1 }
 0x2f8   : > { %v977_v17 = vadd.f32 %v976_v12, %v975_v10  ;;  %v979_v19 = vmul.f32 %v978_v11, %v960_v4  ;;  %v1036_v10 = vld [vmem:[%s3648_s26 + $0x10] sm:$0xff] }
 0x2fa   : > { %v980_v20 = vmul.f32 %v978_v11, %v977_v17  ;;  %v981_v21 = vmul.f32 %v979_v19, %v979_v19  ;;  %v984_v22 = vsub.f32 %v3677_v16, %v979_v19  ;;  %v985_v23 = vsub.f32 %v3680_v18, %v979_v19  ;;  %v3718_v18 = vld [vmem:[%s3959_s0 + $0x4] ss:$0 sm:$0xff] }
 0x2fb   : > { %v986_v24 = vsub.f32 %v942_v34, %v979_v19  ;;  %v987_v26 = vsub.f32 %v943_v38, %v979_v19  ;;  %v988_v27 = vsub.f32 %v944_v52, %v979_v19  ;;  %v989_v28 = vsub.f32 %v945_v56, %v979_v19 }
 0x2fc   : > { %v982_v29 = vsub.f32 %v980_v20, %v981_v21  ;;  %v2784_v21 = vld [vmem:[#allocation7 + $0x8] sm:$0xff]  }
 0x2fe   : > { %v983_v30 = vmax.f32 %v982_v29, 0.0  ;;  %v1332_v29 = vstv %s3745_s19 }
 0x2ff   : > { %vm1333_vm10 = vcmp.lt.s32.totalorder %v3653_v62, %v1332_v29  ;;  %vm1335_vm11 = vcmp.lt.s32.totalorder %v3668_v13, %v1332_v29  ;;  %vm1334_vm12 = vcmp.lt.s32.totalorder %v3657_v3, %v1332_v29  ;;  %vm1336_vm13 = vcmp.lt.s32.totalorder %v3674_v15, %v1332_v29 }
 0x300   : > { %v990_v31 = vadd.f32 1e-05, %v983_v30  ;;  %v2282_v30 = vld [vmem:[%s3959_s0 + $0x1] ss:$0 sm:$0xff] }
 0x302   : > { %2833 = vrsqrt.f32 %v990_v31 }
 0x30c   : > { %v2834_v33 = vpop.eup %2833 }
 0x30d   : > { %v992_v36 = vmul.f32 %v2834_v33, %v984_v22  ;;  %v993_v37 = vmul.f32 %v2834_v33, %v985_v23  ;;  %v994_v39 = vmul.f32 %v2834_v33, %v986_v24  ;;  %v995_v16 = vmul.f32 %v2834_v33, %v987_v26  ;;  %v2785_v22 = vld [vmem:[#allocation7 + $0x10] sm:$0xff]   ;;  %v2786_v23 = vld [vmem:[#allocation7 + $0x18] sm:$0xff]   ;;  %v2787_v24 = vld [vmem:[#allocation7 + $0x20] sm:$0xff]  }
 0x30e   : > { %v996_v34 = vmul.f32 %v2834_v33, %v988_v27  ;;  %v997_v38 = vmul.f32 %v2834_v33, %v989_v28  ;;  %v2788_v26 = vld [vmem:[#allocation7 + $0x28] sm:$0xff]   ;;  %v2789_v27 = vld [vmem:[#allocation7 + $0x30] sm:$0xff]   ;;  %v2790_v28 = vld [vmem:[#allocation7 + $0x38] sm:$0xff]  }
 0x30f   : > { %v1002_v40 = vmul.f32 %v3713_v35, %v992_v36  ;;  %v1003_v41 = vmul.f32 %v3713_v35, %v993_v37  ;;  %v1004_v42 = vmul.f32 %v3713_v35, %v994_v39  ;;  %v1005_v43 = vmul.f32 %v3713_v35, %v995_v16 }
 0x310   : > { %v1006_v44 = vmul.f32 %v3713_v35, %v996_v34  ;;  %v1007_v46 = vmul.f32 %v3713_v35, %v997_v38  ;;  %v3759_v36 = vsel %vm1333_vm10, 1.0, %v3174_v0  ;;  %v3763_v34 = vsel %vm1335_vm11, 1.0, %v3174_v0 }
 0x311   : > { %v1012_v47 = vadd.f32 %v3718_v18, %v1002_v40  ;;  %v1013_v48 = vadd.f32 %v3718_v18, %v1003_v41  ;;  %v1014_v49 = vadd.f32 %v3718_v18, %v1004_v42  ;;  %v1015_v50 = vadd.f32 %v3718_v18, %v1005_v43 }
 0x312   : > { %v1016_v52 = vadd.f32 %v3718_v18, %v1006_v44  ;;  %v1017_v53 = vadd.f32 %v3718_v18, %v1007_v46  ;;  %v2284_v40 = vsel %vm1334_vm12, 1.0, %v3174_v0  ;;  %v2286_v43 = vsel %vm1336_vm13, 1.0, %v3174_v0 }
 0x313   : > { %v1018_v54 = vmax.f32 %v1012_v47, 0.0  ;;  %v1019_v55 = vmax.f32 %v1013_v48, 0.0  ;;  %v1020_v56 = vmax.f32 %v1014_v49, 0.0  ;;  %v1021_v57 = vmax.f32 %v1015_v50, 0.0 }
 0x314   : > { %v1022_v58 = vmax.f32 %v1016_v52, 0.0  ;;  %v1023_v59 = vmax.f32 %v1017_v53, 0.0 }
 0x315   : > { %v1024_v60 = vmul.f32 %v3665_v8, %v1018_v54  ;;  %v1025_v61 = vmul.f32 %v3671_v14, %v1019_v55  ;;  %v1026_v1 = vmul.f32 %v3691_v25, %v1020_v56  ;;  %v1027_v2 = vmul.f32 %v3695_v32, %v1021_v57  ;;  %v1037_v8 = vld [vmem:[%s3648_s26 + $0x18] sm:$0xff]  ;;  %v2783_v32 = vld [vmem:[#allocation7] sm:$0xff]   ;;  %s1349_s26 = scvt.s32.f32 %s3745_s19  ;;  %s3865_s19 = scalar_lea.hbm %s3960_s1, %s2341_s27 }
 0x316   : > { %v1028_v5 = vmul.f32 %v3701_v45, %v1022_v58  ;;  %v1029_v63 = vmul.f32 %v3704_v51, %v1023_v59  ;;  %v1039_v14 = vpack.c.bf16 %v1037_v8, %v1036_v10  ;;  %v2782_v25 = vld [vmem:[#allocation9 + $0x38] sm:$0xff]  }
 0x317   : > { %v1030_v6 = vpack.c.bf16 %v1025_v61, %v1024_v60  ;;  %v1031_v7 = vpack.c.bf16 %v1027_v2, %v1026_v1  ;;  %2502 = vmatprep.subr.bf16.mxu1 %v2782_v25  ;;  %v1350_v45 = vstv %s1349_s26  ;;  %s3176_s26 = smov [#allocation18]  }
 0x318   : > { %v1032_v9 = vpack.c.bf16 %v1029_v63, %v1028_v5  ;;  %2503 = vmatpush3.bf16.msra.mxu1 %v2782_v25  ;;  %2835 = vrcp.f32 %v1350_v45  ;;  %s3079_s22 = sshll.u32 %s3176_s26, 4  ;;  %s3080_s22 = int_to_ptr.vmem [resolvable:$false] %s3079_s22 }
 0x319   : > { %2478 = vmatprep.subr.bf16.mxu0 %v1030_v6  ;;  %2508 = vmatprep.subr.bf16.mxu1 %v2783_v32  ;;  %s3081_s24 = scalar_lea.vmem %s3080_s22, 512 }
 0x31a   : > { %2479 = vmatpush3.bf16.msra.mxu0 %v1030_v6 }
 0x31b   : > { %2480 = vmatprep.subr.bf16.mxu0 %v1031_v7 }
 0x31e   : > { %2481 = vmatpush3.bf16.msra.mxu0 %v1031_v7 }
 0x31f   : > { %2482 = vmatprep.subr.bf16.mxu0 %v1032_v9 }
 0x322   : > { %2483 = vmatpush3.bf16.msra.mxu0 %v1032_v9  ;;  %v2836_v51 = vpop.eup %2835 }
 0x323   : > { %2528 = vmatprep.subr.bf16.mxu0 %v3174_v0  ;;  %2643 = vpush %v2836_v51 }
 0x325   : > { %2485 = vmatmul.mubr.msk.bf16.vlgmr.msra.gmra.mrb[12].mxu0 %vm1040_vm3, %v1039_v14 }
 0x326   : > { %2532 = vmatprep.mubr.msk.bf16.mxu0 %vm3175_vm0, %v3174_v0 }
 0x354   : > { %s2644_s23 = spop %2643 }
 0x3f8   : > { %v2486_v11 = vpop.f32.mrb[12].mxu0 }
 0x3f9   : > { %v1081_v4 = vpop.f32.mrb[13].mxu0 }
 0x3fa   : > { %v2487_v12 = vpop.f32.mrb[14].mxu0 }
 0x3fb   : > { %v1113_v17 = vpack.c.bf16 %v2487_v12, %v2486_v11  ;;  %v1084_v19 = vpop.f32.mrb[15].mxu0 }
 0x3fc   : > { %v1112_v20 = vpack.c.bf16 %v1084_v19, %v1081_v4 }
 0x3fe   : > { %2504 = vmatprep.mubr.bf16.mxu1 %v1112_v20 }
 0x3ff   : > { %2505 = vmatmul.mubr.bf16.vlgmr.msra.gmra.mrb[24].mxu1 %v1113_v17 }
 0x400   : > { %2509 = vmatpush3.bf16.msra.mxu1 %v2783_v32  ;;  %2524 = vmatprep.mubr.bf16.mxu1 %v1030_v6 }
 0x401   : > { %2510 = vmatprep.subr.bf16.mxu1 %v2784_v21 }
 0x404   : > { %2511 = vmatpush3.bf16.msra.mxu1 %v2784_v21 }
 0x405   : > { %2512 = vmatprep.subr.bf16.mxu1 %v2785_v22 }
 0x408   : > { %2513 = vmatpush3.bf16.msra.mxu1 %v2785_v22 }
 0x409   : > { %2514 = vmatprep.subr.bf16.mxu1 %v2786_v23 }
 0x40c   : > { %2515 = vmatpush3.bf16.msra.mxu1 %v2786_v23 }
 0x40d   : > { %2516 = vmatprep.subr.bf16.mxu1 %v2787_v24 }
 0x410   : > { %2517 = vmatpush3.bf16.msra.mxu1 %v2787_v24 }
 0x411   : > { %2518 = vmatprep.subr.bf16.mxu1 %v2788_v26 }
 0x414   : > { %2519 = vmatpush3.bf16.msra.mxu1 %v2788_v26 }
 0x415   : > { %2520 = vmatprep.subr.bf16.mxu1 %v2789_v27 }
 0x418   : > { %2521 = vmatpush3.bf16.msra.mxu1 %v2789_v27 }
 0x419   : > { %2522 = vmatprep.subr.bf16.mxu1 %v2790_v28 }
 0x41c   : > { %2523 = vmatpush3.bf16.msra.mxu1 %v2790_v28 }
 0x41d   : > { %2576 = vmatprep.subr.bf16.mxu1 %v3174_v0 }
 0x41f   : > { %2525 = vmatmul.mubr.bf16.vlgmr.msra.gmra.mrb[24].mxu1 %v1031_v7  ;;  %v1375_v7 = vstv %s2644_s23 }
 0x420   : > { %2592 = vmatprep.mubr.msk.bf16.mxu1 %vm3175_vm0, %v3174_v0 }
 0x4f2   : > { %v2526_v31 = vpop.f32.mrb[24].mxu1 }
 0x4f3   : > { %v1309_v33 = vpop.f32.mrb[25].mxu1  ;;  %v1330_v37 = vadd.f32 %v2526_v31, %v2282_v30 }
 0x4f4   : > { %v1328_v39 = vadd.f32 %v2282_v30, %v1309_v33  ;;  %v2527_v16 = vpop.f32.mrb[26].mxu1 }
 0x4f5   : > { %v1312_v38 = vpop.f32.mrb[27].mxu1  ;;  %v1331_v13 = vadd.f32 %v2527_v16, %v2282_v30  ;;  %v1347_v44 = vmul.f32 %v3763_v34, %v1330_v37 }
 0x4f6   : > { %v1345_v41 = vmul.f32 %v3759_v36, %v1328_v39  ;;  %v1329_v42 = vadd.f32 %v2282_v30, %v1312_v38 }
 0x4f7   : > { %v1348_v48 = vmul.f32 %v2286_v43, %v1331_v13  ;;  %v1364_v15 = vmul.f32 %v1347_v44, %v1347_v44 }
 0x4f8   : > { %v1346_v46 = vmul.f32 %v2284_v40, %v1329_v42  ;;  %v1362_v47 = vmul.f32 %v1345_v41, %v1345_v41 }
 0x4f9   : > { %v1365_v54 = vmul.f32 %v1348_v48, %v1348_v48 }
 0x4fa   : > { %v1353_v49 = vadd.f32 %v1346_v46, %v1345_v41  ;;  %v1363_v50 = vmul.f32 %v1346_v46, %v1346_v46 }
 0x4fc   : > { %v1354_v52 = vadd.f32 %v1353_v49, %v1347_v44  ;;  %v1366_v53 = vadd.f32 %v1363_v50, %v1362_v47  ;;  %v1411_v49 = vld [vmem:[%s3564_s5 + $0x8] sm:$0xff]  ;;  %v2791_v50 = vld [vmem:[#allocation12] sm:$0xff]  }
 0x4fe   : > { %v1367_v55 = vadd.f32 %v1366_v53, %v1364_v15  ;;  %v1355_v56 = vadd.f32 %v1354_v52, %v1348_v48  ;;  %v2796_v15 = vld [vmem:[#allocation12 + $0x28] sm:$0xff]   ;;  %v2797_v52 = vld [vmem:[#allocation12 + $0x30] sm:$0xff]   ;;  %v2798_v53 = vld [vmem:[#allocation12 + $0x38] sm:$0xff]  }
 0x500   : > { %v1356_v57 = vrot.slane %v1355_v56, 4  ;;  %v1368_v58 = vadd.f32 %v1367_v55, %v1365_v54 }
 0x502   : > { %v1357_v59 = vadd.f32 %v1356_v57, %v1355_v56  ;;  %v1369_v60 = vrot.slane %v1368_v58, 4  ;;  %v2799_v57 = vld [vmem:[#allocation10] sm:$0xff]  }
 0x504   : > { %v1358_v61 = vrot.slane %v1357_v59, 2  ;;  %v1370_v1 = vadd.f32 %v1369_v60, %v1368_v58  ;;  %v2800_v60 = vld [vmem:[#allocation10 + $0x8] sm:$0xff]  }
 0x506   : > { %v1359_v2 = vadd.f32 %v1358_v61, %v1357_v59  ;;  %v1371_v5 = vrot.slane %v1370_v1, 2  ;;  %v2801_v61 = vld [vmem:[#allocation10 + $0x10] sm:$0xff]  }
 0x508   : > { %v1360_v63 = vrot.slane %v1359_v2, 1  ;;  %v1372_v6 = vadd.f32 %v1371_v5, %v1370_v1  ;;  %v2802_v1 = vld [vmem:[#allocation10 + $0x18] sm:$0xff]   ;;  %v2804_v5 = vld [vmem:[#allocation10 + $0x28] sm:$0xff]  }
 0x50a   : > { %v1361_v9 = vadd.f32 %v1360_v63, %v1359_v2  ;;  %v1373_v10 = vrot.slane %v1372_v6, 1  ;;  %v2803_v2 = vld [vmem:[#allocation10 + $0x20] sm:$0xff]   ;;  %v2805_v63 = vld [vmem:[#allocation10 + $0x30] sm:$0xff]  }
 0x50c   : > { %v1374_v8 = vadd.f32 %v1373_v10, %v1372_v6  ;;  %v1376_v14 = vmul.f32 %v1375_v7, %v1361_v9  ;;  %v2806_v6 = vld [vmem:[#allocation10 + $0x38] sm:$0xff]   ;;  %v2808_v9 = vld [vmem:[#allocation13 + $0x8] sm:$0xff]   ;;  %v2809_v10 = vld [vmem:[#allocation13 + $0x10] sm:$0xff]  }
 0x50e   : > { %v1377_v25 = vmul.f32 %v1375_v7, %v1374_v8  ;;  %v1378_v32 = vmul.f32 %v1376_v14, %v1376_v14  ;;  %v1381_v45 = vsub.f32 %v1345_v41, %v1376_v14  ;;  %v1382_v51 = vsub.f32 %v1346_v46, %v1376_v14  ;;  %v2807_v7 = vld [vmem:[#allocation13] sm:$0xff]   ;;  %v2810_v8 = vld [vmem:[#allocation13 + $0x18] sm:$0xff]  }
 0x50f   : > { %v1383_v11 = vsub.f32 %v1347_v44, %v1376_v14  ;;  %v1384_v4 = vsub.f32 %v1348_v48, %v1376_v14  ;;  %v1410_v48 = vld [vmem:[%s3564_s5] sm:$0xff]  ;;  %2577 = vmatpush3.bf16.msra.mxu1 %v2807_v7  ;;  %s661_s5 = sadd.s32 3, %s3638_s7 }
 0x510   : > { %v1379_v12 = vsub.f32 %v1377_v25, %v1378_v32  ;;  %2578 = vmatprep.subr.bf16.mxu1 %v3174_v0  ;;  %v2811_v14 = vld [vmem:[#allocation13 + $0x20] sm:$0xff]   ;;  %v2812_v25 = vld [vmem:[#allocation13 + $0x28] sm:$0xff]   ;;  %v2813_v32 = vld [vmem:[#allocation13 + $0x30] sm:$0xff]   ;;  %s662_s14 = sld [smem:[#allocation3 + %s661_s5]]  ;;  %s637_s5 = scalar_lea.vmem [#allocation18], %s2229_s21 }
 0x512   : > { %v1380_v17 = vmax.f32 %v1379_v12, 0.0  ;;  %v2818_v12 = vld [vmem:[#allocation15 + $0x18] sm:$0xff]  }
 0x513   : > { %2579 = vmatpush3.bf16.msra.mxu1 %v2808_v9 }
 0x514   : > { %v1385_v19 = vadd.f32 1e-05, %v1380_v17  ;;  %2580 = vmatprep.subr.bf16.mxu1 %v3174_v0  ;;  %v2819_v17 = vld [vmem:[#allocation15 + $0x20] sm:$0xff]  }
 0x516   : > { %2837 = vrsqrt.f32 %v1385_v19  ;;  %v2820_v19 = vld [vmem:[#allocation15 + $0x28] sm:$0xff]  }
 0x517   : > { %2581 = vmatpush3.bf16.msra.mxu1 %v2809_v10 }
 0x518   : > { %2582 = vmatprep.subr.bf16.mxu1 %v3174_v0 }
 0x51b   : > { %2583 = vmatpush3.bf16.msra.mxu1 %v2810_v8 }
 0x51c   : > { %2584 = vmatprep.subr.bf16.mxu1 %v3174_v0 }
 0x51f   : > { %2585 = vmatpush3.bf16.msra.mxu1 %v2811_v14 }
 0x520   : > { %v2838_v20 = vpop.eup %2837  ;;  %2586 = vmatprep.subr.bf16.mxu1 %v3174_v0 }
 0x521   : > { %v1387_v21 = vmul.f32 %v2838_v20, %v1381_v45  ;;  %v1388_v22 = vmul.f32 %v2838_v20, %v1382_v51  ;;  %v1389_v23 = vmul.f32 %v2838_v20, %v1383_v11  ;;  %v1390_v24 = vmul.f32 %v2838_v20, %v1384_v4  ;;  %v2814_v45 = vld [vmem:[#allocation13 + $0x38] sm:$0xff]   ;;  %v2815_v51 = vld [vmem:[#allocation15] sm:$0xff]   ;;  %v2816_v11 = vld [vmem:[#allocation15 + $0x8] sm:$0xff]  }
 0x522   : > { %v2817_v4 = vld [vmem:[#allocation15 + $0x10] sm:$0xff]  }
 0x523   : > { %v1391_v26 = vmul.f32 %v3713_v35, %v1387_v21  ;;  %v1392_v27 = vmul.f32 %v3713_v35, %v1388_v22  ;;  %v1393_v28 = vmul.f32 %v3713_v35, %v1389_v23  ;;  %v1394_v29 = vmul.f32 %v3713_v35, %v1390_v24  ;;  %2587 = vmatpush3.bf16.msra.mxu1 %v2812_v25 }
 0x524   : > { %2588 = vmatprep.subr.bf16.mxu1 %v3174_v0  ;;  %v1675_v24 = vstv %s662_s14  ;;  %s2039_s14 = sshll.u32 %s637_s5, 4  ;;  %s3860_s14 = int_to_ptr.vmem [resolvable:$true] %s2039_s14 }
 0x525   : > { %v1395_v30 = vadd.f32 %v3718_v18, %v1391_v26  ;;  %v1396_v31 = vadd.f32 %v3718_v18, %v1392_v27  ;;  %v1397_v33 = vadd.f32 %v3718_v18, %v1393_v28  ;;  %v1398_v37 = vadd.f32 %v3718_v18, %v1394_v29  ;;  %v2304_v26 = vld [vmem:[%s3959_s0 + $0x2] ss:$0 sm:$0xff]  ;;  %s3075_s21 = scalar_lea.vmem %s3860_s14, 256  ;;  %p3082_p10 = scmp.lt.s32.totalorder %s3860_s14, %s3080_s22 }
 0x526   : > { %v1412_v18 = vpack.c.bf16 %v1411_v49, %v1410_v48  ;;  %vm1676_vm15 = vcmp.lt.s32.totalorder %v3653_v62, %v1675_v24  ;;  %vm1677_vm1 = vcmp.lt.s32.totalorder %v3657_v3, %v1675_v24  ;;  %v2821_v62 = vld [vmem:[#allocation15 + $0x30] sm:$0xff]   ;;  %v2822_v3 = vld [vmem:[#allocation15 + $0x38] sm:$0xff]   ;;  %v2827_v48 = vld [vmem:[#allocation16 + $0x20] sm:$0xff]   ;;  %p3076_p4 = scmp.ne.s32.totalorder %s3860_s14, %s3075_s21  ;;  %p3083_p8 = scmp.lt.s32.totalorder %s3081_s24, %s3075_s21 }
 0x527   : > { %v1399_v39 = vmax.f32 %v1395_v30, 0.0  ;;  %v1400_v16 = vmax.f32 %v1396_v31, 0.0  ;;  %v1401_v38 = vmax.f32 %v1397_v33, 0.0  ;;  %v1402_v41 = vmax.f32 %v1398_v37, 0.0  ;;  %2589 = vmatpush3.bf16.msra.mxu1 %v2813_v32  ;;  %v2828_v49 = vld [vmem:[#allocation16 + $0x28] sm:$0xff]  }
 0x528   : > { %2590 = vmatprep.subr.bf16.mxu1 %v3174_v0  ;;  %p3077_p3 = pnand %p3076_p4, %p3961_p2  ;;  %p3084_p13 = por %p3083_p8, %p3082_p10 }
 0x529   : > { %v1403_v13 = vmul.f32 %v3759_v36, %v1399_v39  ;;  %v1404_v42 = vmul.f32 %v2284_v40, %v1400_v16  ;;  %v1405_v44 = vmul.f32 %v3763_v34, %v1401_v38  ;;  %v1406_v35 = vmul.f32 %v2286_v43, %v1402_v41  ;;  %v2792_v36 = vld [vmem:[#allocation12 + $0x8] sm:$0xff]   ;;  %v2793_v34 = vld [vmem:[#allocation12 + $0x10] sm:$0xff]   ;;  %v2794_v40 = vld [vmem:[#allocation12 + $0x18] sm:$0xff]  }
 0x52a   : > { %v2795_v43 = vld [vmem:[#allocation12 + $0x20] sm:$0xff]   ;;  %v3830_v39 = vsel %vm1676_vm15, 1.0, %v3174_v0  ;;  %v3833_v16 = vsel %vm1677_vm1, 1.0, %v3174_v0  ;;  %p3078_p5 = pneg %p3077_p3 }
 0x52b   : > { %v3779_v46 = vpack.c.bf16 %v1404_v42, %v1403_v13  ;;  %v1408_v47 = vpack.c.bf16 %v1406_v35, %v1405_v44  ;;  %2591 = vmatpush3.bf16.msra.mxu1 %v2814_v45  ;;  %v2823_v44 = vld [vmem:[#allocation16] sm:$0xff]   ;;  %v2824_v35 = vld [vmem:[#allocation16 + $0x8] sm:$0xff]  }
 0x52c   : > { %2616 = vmatprep.subr.bf16.mxu1 %v3174_v0  ;;  %p3085_p0 = pnand %p3084_p13, %p3078_p5 }
 0x52d   : > { %2529 = vmatpush3.bf16.msra.mxu0 %v3779_v46 }
 0x52e   : > { %2530 = vmatprep.subr.bf16.mxu0 %v3174_v0 }
 0x531   : > { %2531 = vmatpush3.bf16.msra.mxu0 %v1408_v47  ;;  %v2826_v47 = vld [vmem:[#allocation16 + $0x18] sm:$0xff]  }
 0x532   : > { %2536 = vmatprep.subr.bf16.mxu0 %v3174_v0 }
 0x534   : > { %2533 = vmatmul.mubr.msk.bf16.vlgmr.msra.gmra.mrb[16].mxu0 %vm1413_vm14, %v1412_v18  ;;  %v2307_v18 = vld [vmem:[%s3959_s0 + $0x5] ss:$0 sm:$0xff] }
 0x535   : > { %2537 = vmatpush3.bf16.msra.mxu0 %v2791_v50  ;;  %2552 = vmatprep.mubr.msk.bf16.mxu0 %vm3175_vm0, %v3174_v0 }
 0x536   : > { %2538 = vmatprep.subr.bf16.mxu0 %v3174_v0 }
 0x539   : > { %2539 = vmatpush3.bf16.msra.mxu0 %v2792_v36 }
 0x53a   : > { %2540 = vmatprep.subr.bf16.mxu0 %v3174_v0 }
 0x53d   : > { %2541 = vmatpush3.bf16.msra.mxu0 %v2793_v34 }
 0x53e   : > { %2542 = vmatprep.subr.bf16.mxu0 %v3174_v0 }
 0x541   : > { %2543 = vmatpush3.bf16.msra.mxu0 %v2794_v40 }
 0x542   : > { %2544 = vmatprep.subr.bf16.mxu0 %v3174_v0 }
 0x545   : > { %2545 = vmatpush3.bf16.msra.mxu0 %v2795_v43 }
 0x546   : > { %2546 = vmatprep.subr.bf16.mxu0 %v3174_v0 }
 0x549   : > { %2547 = vmatpush3.bf16.msra.mxu0 %v2796_v15 }
 0x54a   : > { %2548 = vmatprep.subr.bf16.mxu0 %v3174_v0 }
 0x54d   : > { %2549 = vmatpush3.bf16.msra.mxu0 %v2797_v52 }
 0x54e   : > { %2550 = vmatprep.subr.bf16.mxu0 %v3174_v0 }
 0x551   : > { %2551 = vmatpush3.bf16.msra.mxu0 %v2798_v53 }
 0x552   : > { %2556 = vmatprep.subr.bf16.mxu0 %v3174_v0 }
 0x607   : > { %v1451_v54 = vpop.f32.mrb[16].mxu0 }
 0x608   : > { %v2534_v55 = vpop.f32.mrb[17].mxu0 }
 0x609   : > { %v1454_v56 = vpop.f32.mrb[18].mxu0  ;;  %v2829_v55 = vld [vmem:[#allocation16 + $0x30] sm:$0xff]  }
 0x60a   : > { %v1474_v58 = vpack.c.bf16 %v1454_v56, %v1451_v54  ;;  %v2535_v59 = vpop.f32.mrb[19].mxu0  ;;  %v2830_v56 = vld [vmem:[#allocation16 + $0x38] sm:$0xff]  }
 0x60c   : > { %2553 = vmatmul.mubr.bf16.vlgmr.msra.gmra.mrb[20].mxu0 %v1474_v58  ;;  %v2316_v58 = vld [vmem:[%s3959_s0 + $0x6] ss:$0 sm:$0xff] }
 0x60d   : > { %2557 = vmatpush3.bf16.msra.mxu0 %v2799_v57  ;;  %2572 = vmatprep.mubr.msk.bf16.mxu0 %vm3175_vm0, %v3174_v0  ;;  %v1927_v57 = vld [vmem:[%s3959_s0 + $0x7] sm:$0x1] }
 0x60e   : > { %2558 = vmatprep.subr.bf16.mxu0 %v3174_v0  ;;  %2645 = vpush %v1927_v57 }
 0x611   : > { %2559 = vmatpush3.bf16.msra.mxu0 %v2800_v60 }
 0x612   : > { %2560 = vmatprep.subr.bf16.mxu0 %v3174_v0 }
 0x615   : > { %2561 = vmatpush3.bf16.msra.mxu0 %v2801_v61 }
 0x616   : > { %2562 = vmatprep.subr.bf16.mxu0 %v3174_v0 }
 0x619   : > { %2563 = vmatpush3.bf16.msra.mxu0 %v2802_v1 }
 0x61a   : > { %2564 = vmatprep.subr.bf16.mxu0 %v3174_v0 }
 0x61d   : > { %2565 = vmatpush3.bf16.msra.mxu0 %v2803_v2 }
 0x61e   : > { %2566 = vmatprep.subr.bf16.mxu0 %v3174_v0 }
 0x621   : > { %2567 = vmatpush3.bf16.msra.mxu0 %v2804_v5 }
 0x622   : > { %2568 = vmatprep.subr.bf16.mxu0 %v3174_v0 }
 0x625   : > { %2569 = vmatpush3.bf16.msra.mxu0 %v2805_v63 }
 0x626   : > { %2570 = vmatprep.subr.bf16.mxu0 %v3174_v0 }
 0x629   : > { %2571 = vmatpush3.bf16.msra.mxu0 %v2806_v6 }
 0x62a   : > { %2596 = vmatprep.subr.bf16.mxu0 %v3174_v0 }
 0x62c   : > { %2573 = vmatmul.mubr.bf16.vlgmr.msra.gmra.mrb[24].mxu0 %v3779_v46  ;;  %v2825_v46 = vld [vmem:[#allocation16 + $0x10] sm:$0xff]  }
 0x62d   : > { %2612 = vmatprep.mubr.msk.bf16.mxu0 %vm3175_vm0, %v3174_v0  ;;  %2597 = vmatpush3.bf16.msra.mxu0 %v2815_v51 }
 0x62e   : > { %2598 = vmatprep.subr.bf16.mxu0 %v3174_v0 }
 0x631   : > { %2599 = vmatpush3.bf16.msra.mxu0 %v2816_v11 }
 0x632   : > { %2600 = vmatprep.subr.bf16.mxu0 %v3174_v0 }
 0x635   : > { %2601 = vmatpush3.bf16.msra.mxu0 %v2817_v4 }
 0x636   : > { %2602 = vmatprep.subr.bf16.mxu0 %v3174_v0 }
 0x639   : > { %2603 = vmatpush3.bf16.msra.mxu0 %v2818_v12 }
 0x63a   : > { %2604 = vmatprep.subr.bf16.mxu0 %v3174_v0 }
 0x63d   : > { %2605 = vmatpush3.bf16.msra.mxu0 %v2819_v17 }
 0x63e   : > { %2606 = vmatprep.subr.bf16.mxu0 %v3174_v0 }
 0x63f   : > { %s2646_s23 = spop %2645 }
 0x640   : > { %v1930_v7 = vstv %s2646_s23 }
 0x641   : > { %2607 = vmatpush3.bf16.msra.mxu0 %v2820_v19 }
 0x642   : > { %2608 = vmatprep.subr.bf16.mxu0 %v3174_v0 }
 0x645   : > { %2609 = vmatpush3.bf16.msra.mxu0 %v2821_v62 }
 0x646   : > { %2610 = vmatprep.subr.bf16.mxu0 %v3174_v0 }
 0x649   : > { %2611 = vmatpush3.bf16.msra.mxu0 %v2822_v3 }
 0x6df   : > { %v1573_v20 = vpop.f32.mrb[20].mxu0 }
 0x6e0   : > { %v2554_v21 = vpop.f32.mrb[21].mxu0 }
 0x6e1   : > { %v1576_v22 = vpop.f32.mrb[22].mxu0 }
 0x6e2   : > { %v2555_v23 = vpop.f32.mrb[23].mxu0 }
 0x6ff   : > { %v1662_v27 = vpop.f32.mrb[24].mxu0 }
 0x700   : > { %v1663_v28 = vadd.f32 %v1662_v27, %v1573_v20  ;;  %v2574_v29 = vpop.f32.mrb[25].mxu0 }
 0x701   : > { %v1665_v30 = vpop.f32.mrb[26].mxu0 }
 0x702   : > { %v1673_v31 = vadd.f32 %v2304_v26, %v1663_v28  ;;  %v1666_v33 = vadd.f32 %v1665_v30, %v1576_v22  ;;  %v2575_v37 = vpop.f32.mrb[27].mxu0 }
 0x704   : > { %v1674_v38 = vadd.f32 %v2304_v26, %v1666_v33  ;;  %v1682_v41 = vmul.f32 %v3830_v39, %v1673_v31 }
 0x706   : > { %v1683_v13 = vmul.f32 %v3833_v16, %v1674_v38 }
 0x708   : > { %v1684_v42 = vpack.c.bf16 %v1683_v13, %v1682_v41 }
 0x70a   : > { %2593 = vmatmul.mubr.bf16.vlgmr.msra.gmra.mrb[28].mxu1 %v1684_v42 }
 0x70b   : > { %2632 = vmatprep.mubr.msk.bf16.mxu1 %vm3175_vm0, %v3174_v0  ;;  %2617 = vmatpush3.bf16.msra.mxu1 %v2823_v44 }
 0x70c   : > { %2618 = vmatprep.subr.bf16.mxu1 %v3174_v0 }
 0x70f   : > { %2619 = vmatpush3.bf16.msra.mxu1 %v2824_v35 }
 0x710   : > { %2620 = vmatprep.subr.bf16.mxu1 %v3174_v0 }
 0x713   : > { %2621 = vmatpush3.bf16.msra.mxu1 %v2825_v46 }
 0x714   : > { %2622 = vmatprep.subr.bf16.mxu1 %v3174_v0 }
 0x717   : > { %2623 = vmatpush3.bf16.msra.mxu1 %v2826_v47 }
 0x718   : > { %2624 = vmatprep.subr.bf16.mxu1 %v3174_v0 }
 0x71b   : > { %2625 = vmatpush3.bf16.msra.mxu1 %v2827_v48 }
 0x71c   : > { %2626 = vmatprep.subr.bf16.mxu1 %v3174_v0 }
 0x71f   : > { %2627 = vmatpush3.bf16.msra.mxu1 %v2828_v49 }
 0x720   : > { %2628 = vmatprep.subr.bf16.mxu1 %v3174_v0 }
 0x723   : > { %2629 = vmatpush3.bf16.msra.mxu1 %v2829_v55 }
 0x724   : > { %2630 = vmatprep.subr.bf16.mxu1 %v3174_v0 }
 0x727   : > { %2631 = vmatpush3.bf16.msra.mxu1 %v2830_v56 }
 0x7dd   : > { %v1788_v50 = vpop.f32.mrb[28].mxu1 }
 0x7de   : > { %v1789_v36 = vadd.f32 %v2307_v18, %v1788_v50  ;;  %v2594_v34 = vpop.f32.mrb[29].mxu1 }
 0x7df   : > { %v1791_v40 = vpop.f32.mrb[30].mxu1 }
 0x7e0   : > { %v1792_v43 = vadd.f32 %v2307_v18, %v1791_v40  ;;  %v2595_v15 = vpop.f32.mrb[31].mxu1  ;;  %v1795_v52 = vmax.f32 %v1789_v36, 0.0 }
 0x7e2   : > { %v1796_v53 = vmax.f32 %v1792_v43, 0.0 }
 0x7e4   : > { %v1797_v54 = vpack.c.bf16 %v1796_v53, %v1795_v52 }
 0x7e6   : > { %2613 = vmatmul.mubr.bf16.vlgmr.msra.gmra.mrb[28].mxu0 %v1797_v54 }
 0x8b9   : > { %v1901_v59 = vpop.f32.mrb[28].mxu0 }
 0x8ba   : > { %v1902_v60 = vadd.f32 %v2316_v58, %v1901_v59  ;;  %v2614_v61 = vpop.f32.mrb[29].mxu0 }
 0x8bb   : > { %v1904_v1 = vpop.f32.mrb[30].mxu0 }
 0x8bc   : > { %v1905_v2 = vadd.f32 %v2316_v58, %v1904_v1  ;;  %v2615_v5 = vpop.f32.mrb[31].mxu0  ;;  %v1908_v0 = vmax.f32 %v1902_v60, 0.0 }
 0x8be   : > { %v1909_v63 = vmax.f32 %v1905_v2, 0.0 }
 0x8c0   : > { %v1910_v6 = vpack.c.bf16 %v1909_v63, %v1908_v0 }
 0x8c2   : > { %2633 = vmatmul.mubr.bf16.vlgmr.msra.gmra.mrb[32].mxu1 %v1910_v6 }
 0x995   : > { %v2014_v9 = vpop.f32.mrb[32].mxu1 }
 0x996   : > { %v2015_v10 = vadd.f32 %v2014_v9, %v1930_v7  ;;  %v2634_v8 = vpop.f32.mrb[33].mxu1 }
 0x997   : > { %v2017_v14 = vpop.f32.mrb[34].mxu1 }
 0x998   : > { %v2021_v25 = vmul.f32 %v3830_v39, %v2015_v10  ;;  %v2018_v32 = vadd.f32 %v2017_v14, %v1930_v7  ;;  %v2635_v45 = vpop.f32.mrb[35].mxu1 }
 0x99a   : > { %2023 = vst [vmem:[%s637_s5] sm:$0xff] %v2021_v25  ;;  %v2022_v51 = vmul.f32 %v3833_v16, %v2018_v32 }
 0x99c   : > { %2024 = vst [vmem:[%s637_s5 + $0x8] sm:$0xff] %v2022_v51 }
 0x99d   : > { %3088 = shalt.err (!%p3085_p0)
}
 0x99e   : > { %s3089_s23 = scalar_lea.hbm %s3865_s19, 256  ;;  %s3093_s17 = scalar_lea.hbm %s3960_s1, 1024 }
 0x99f   : > { %p3090_p6 = scmp.ne.s32.totalorder %s3865_s19, %s3089_s23  ;;  %p3094_p9 = scmp.lt.u32.totalorder %s3865_s19, %s3960_s1 }
 0x9a0   : > { %p3095_p12 = scmp.lt.u32.totalorder %s3093_s17, %s3089_s23  ;;  %p3097_p4 = scmp.lt.u32.totalorder %s3089_s23, %s3865_s19 }
 0x9a1   : > { %p3091_p7 = pnand %p3090_p6, %p3961_p2 }
 0x9a2   : > { %p3096_p1 = por %p3095_p12, %p3094_p9 }
 0x9a3   : > { %p3092_p11 = pneg %p3091_p7 }
 0x9a4   : > { %p3098_p3 = por %p3097_p4, %p3096_p1 }
 0x9a6   : > { %p3099_p5 = pnand %p3098_p3, %p3092_p11 }
 0x9a8   : > { %3102 = shalt.err (!%p3099_p5)
}
 0x9a9   : > { %s3177_s21 = smov 128   ;;  %s3178_s22 = smov 8  }
 0x9aa   : > { %2677 = dma.vmem_to_hbm [thread:$0]  (%p3961_p2), %s3860_s14, 256, %s3865_s19, %s2026_s18, %s3177_s21, %s3177_s21, %s3178_s22  }
 0x9ab PF: > { %p2724_p10 = scmp.ge.s32.totalorder %s3159_s16, 2  ;;  %s2054_s24 = sand.u32 1, %s3147_s28  }
 0x9ac   : > { %p3962_p8 = scmp.ne.s32.totalorder %s3944_s6, 0  ;;  %s2055_s23 = scalar_lea.sflag [#allocation6], %s2054_s24 }
 0x9ae   : > { %p2706_p13 = pnand %p2724_p10, %p3962_p8 }
 0x9b0   : > { %3142 = dma.done.wait (!%p2706_p13), %s2055_s23, 256  }
 0x9b1   : > { %3144 = vsyncadd (!%p2706_p13), %s2055_s23, 4294967040  ;;  %p36_p0 = scmp.ge.s32.totalorder %s3485_s20, 6   ;;  %s3963_s28 = smov %s3151_s29 }
 0x9b2   : > { %s3964_s29 = smov %s3155_s30  ;;  %s3965_s30 = smov %s3497_s2 }
 0x9b3   : > { %s3966_s16 = smov %s3485_s20  ;;  %38 = sbr.rel (!%p36_p0) target bundleno = 23 (0x17), region = 158 }
 0x9ba   :  { %2060 = vsyncpa [#allocation5], 1 }
 0x9bb   :  { %2062 = vsyncpa [#allocation5 + $0x1], 1 }
 0x9bc   :  { %2063 = vsyncpa [#allocation8], 1 }
 0x9bd   :  { %2064 = vsyncpa [#allocation11], 1 }
 0x9be   :  { %2065 = vsyncpa [#allocation14], 1 }
 0x9bf   :  { %2066 = vsyncpa [#allocation17], 1 }
 0x9c0   :  { %2067 = vsyncpa [#allocation6], 1 }
 0x9c1   :  { %2069 = vsyncpa [#allocation6 + $0x1], 1 }

</bundles_post_ra>
